<compile_context>
chip_gen: v7x
topology: tpu7x:2x2x1
jax: 0.10.0
libtpu: 0.0.40
codegen_flags: <defaults>
</compile_context>

<pallas_src>
import numpy as np
import jax
import jax.numpy as jnp
from jax import lax
from jax.experimental import pallas as pl
from jax.experimental.pallas import tpu as pltpu


# ----------------------------------------------------------------- one-time constants
def prepare_params(params):
    """One-time host-side preprocessing of the PyTorch-layout parameters into
    the constants the kernel consumes (banded conv matrices, folded fc1,
    padded fc3, packed biases)."""
    c1w, c1b, c2w, c2b, f1w, f1b, f2w, f2b, f3w, f3b = [
        np.asarray(p, np.float32) for p in params]

    # conv1 as 5 banded matmuls: x[h+kh, n, :32] @ w1[kh].
    # Output lanes: even half lane = j*6 + c (ow = 2j), odd half = 128 + j*6 + c.
    w1 = np.zeros((5 * 32, 256), np.float32)
    for kh in range(5):
        for j in range(14):
            for par in range(2):
                ow = 2 * j + par
                for kw in range(5):
                    w1[kh * 32 + ow + kw,
                       par * 128 + j * 6: par * 128 + j * 6 + 6] = c1w[:, 0, kh, kw]

    # conv2 as 5 banded matmuls over p1 lanes (j_in*6 + cin).
    # Output lanes: even half lane = m*16 + cout (ow = 2m), odd half = 128 + m*16 + cout.
    w2 = np.zeros((5 * 128, 256), np.float32)
    for kh in range(5):
        for m in range(5):
            for par in range(2):
                ow = 2 * m + par
                for kw in range(5):
                    jin = ow + kw
                    w2[kh * 128 + jin * 6: kh * 128 + jin * 6 + 6,
                       par * 128 + m * 16: par * 128 + m * 16 + 16] = c2w[:, :, kh, kw].T

    # fc1 folded over the 5 pooled rows: g1 block `oh` maps p2 lane (m*16 + co)
    # to the PyTorch flatten index co*25 + oh*5 + m.
    g1 = np.zeros((5 * 128, 120), np.float32)
    for oh in range(5):
        for m in range(5):
            for co in range(16):
                g1[oh * 128 + m * 16 + co, :] = f1w[:, co * 25 + oh * 5 + m]

    fw2 = np.ascontiguousarray(f2w.T)                      # (120, 84)
    fw3 = np.zeros((84, 128), np.float32)
    fw3[:, :10] = f3w.T                                    # (84, 128) lane-dense pad

    bias = np.zeros((8, 256), np.float32)                  # one packed bias constant
    bias[0, :84] = np.tile(c1b, 14); bias[0, 128:128 + 84] = bias[0, :84]
    bias[1, :80] = np.tile(c2b, 5);  bias[1, 128:128 + 80] = bias[1, :80]
    bias[2, :120] = f1b
    bias[3, :84] = f2b
    bias[4, :10] = f3b

    return tuple(jnp.asarray(a) for a in (w1, w2, g1, fw2, fw3, bias))


# ----------------------------------------------------------------- fused kernel
def _lenet_kernel(x_ref, w1_ref, w2_ref, g1_ref, fw2_ref, fw3_ref, b_ref, out_ref):
    B = x_ref.shape[1]                         # images in this grid step (multiple of 8)
    bias = b_ref[...]                          # (8, 256)
    x = x_ref[...]                             # (32, B, 32) = (H, N, W)

    # ---- conv1: 5 accumulated banded matmuls (one per kernel row kh) ----------
    acc1 = jnp.zeros((28 * B, 256), jnp.float32)
    for kh in range(5):
        lhs = x[kh:kh + 28].reshape(28 * B, 32)             # rows = (h, n)
        acc1 = acc1 + jnp.dot(lhs, w1_ref[kh * 32:(kh + 1) * 32, :],
                              preferred_element_type=jnp.float32)
    y1 = jnp.maximum(acc1 + bias[0:1, :], 0.0)              # relu(conv1 + b1)
    # 2x2/2 max pool: width = max of even/odd lane-tile halves,
    #                 height = max over adjacent row pairs (tile-aligned reshape).
    yw = jnp.maximum(y1[:, :128], y1[:, 128:])              # (28*B, 128) lanes (j, c)
    t1 = yw.reshape(14, 2, B, 128)
    p1 = jnp.maximum(t1[:, 0], t1[:, 1])                    # (14, B, 128)

    # ---- conv2: 5 accumulated banded matmuls ----------------------------------
    acc2 = jnp.zeros((10 * B, 256), jnp.float32)
    for kh in range(5):
        lhs = p1[kh:kh + 10].reshape(10 * B, 128)           # rows = (oh, n)
        acc2 = acc2 + jnp.dot(lhs, w2_ref[kh * 128:(kh + 1) * 128, :],
                              preferred_element_type=jnp.float32)
    y2 = jnp.maximum(acc2 + bias[1:2, :], 0.0)              # relu(conv2 + b2)
    yw2 = jnp.maximum(y2[:, :128], y2[:, 128:])             # (10*B, 128) lanes (m, co)
    t2 = yw2.reshape(5, 2, B, 128)
    p2 = jnp.maximum(t2[:, 0], t2[:, 1])                    # (5, B, 128)

    # ---- fc head: fc1 folded over the 5 pooled rows (no flatten scatter) ------
    acc3 = jnp.zeros((B, 120), jnp.float32)
    for oh in range(5):
        acc3 = acc3 + jnp.dot(p2[oh], g1_ref[oh * 128:(oh + 1) * 128, :],
                              preferred_element_type=jnp.float32)
    h1 = jnp.maximum(acc3 + bias[2:3, :120], 0.0)           # (B, 120)
    h2 = jnp.maximum(jnp.dot(h1, fw2_ref[...], preferred_element_type=jnp.float32)
                     + bias[3:4, :84], 0.0)                 # (B, 84)
    logits = jnp.dot(h2, fw3_ref[...], preferred_element_type=jnp.float32) \
        + bias[4:5, :128]
    out_ref[...] = logits.astype(out_ref.dtype)             # (B, 128) lane-dense


# ----------------------------------------------------------------- wrapper
def _batch_plan(n):
    """Pad the batch to a sublane multiple and pick images per grid step."""
    npad = ((n + 7) // 8) * 8
    if npad <= 16:
        return npad, npad                       # one step: grid loops are sequential on v5e/v6e
    return npad, (16 if npad % 16 == 0 else 8)  # >=2 steps: feeds both v7x TensorCores


def lenet_forward_pallas(x_hnw, w1, w2, g1, fw2, fw3, bias, *, block):
    npad = x_hnw.shape[1]
    grid = npad // block
    return pl.pallas_call(
        _lenet_kernel,
        out_shape=jax.ShapeDtypeStruct((npad, 128), jnp.float32),
        grid_spec=pltpu.PrefetchScalarGridSpec(
            num_scalar_prefetch=0,
            grid=(grid,),
            in_specs=[
                pl.BlockSpec((32, block, 32), lambda g: (0, g, 0)),  # images (H, N, W)
                pl.BlockSpec((160, 256), lambda g: (0, 0)),          # conv1 banded weights
                pl.BlockSpec((640, 256), lambda g: (0, 0)),          # conv2 banded weights
                pl.BlockSpec((640, 120), lambda g: (0, 0)),          # fc1 folded weights
                pl.BlockSpec((120, 84), lambda g: (0, 0)),           # fc2 weights
                pl.BlockSpec((84, 128), lambda g: (0, 0)),           # fc3 weights (padded)
                pl.BlockSpec((8, 256), lambda g: (0, 0)),            # packed biases
            ],
            out_specs=pl.BlockSpec((block, 128), lambda g: (g, 0)),
        ),
        compiler_params=pltpu.CompilerParams(
            dimension_semantics=("parallel",),
            vmem_limit_bytes=32 * 1024 * 1024,
        ),
    )(x_hnw, w1, w2, g1, fw2, fw3, bias)


@jax.jit
def net_forward(x_nchw, kparams):
    n = x_nchw.shape[0]
    npad, block = _batch_plan(n)
    x_hnw = jnp.transpose(x_nchw[:, 0, :, :], (1, 0, 2))     # (32, N, 32) = (H, N, W)
    x_hnw = jnp.pad(x_hnw, ((0, 0), (0, npad - n), (0, 0)))
    out = lenet_forward_pallas(x_hnw, *kparams, block=block)
    return out[:n, :10]


# ----------------------------------------------------------------- pure-JAX reference
def ref_forward(x_nchw, params):
    (c1w, c1b, c2w, c2b, f1w, f1b, f2w, f2b, f3w, f3b) = params
    dn = ('NCHW', 'OIHW', 'NCHW')
    y = lax.conv_general_dilated(x_nchw, c1w, (1, 1), 'VALID', dimension_numbers=dn)
    y = jnp.maximum(y + c1b[None, :, None, None], 0.0)
    y = lax.reduce_window(y, -jnp.inf, lax.max, (1, 1, 2, 2), (1, 1, 2, 2), 'VALID')
    y = lax.conv_general_dilated(y, c2w, (1, 1), 'VALID', dimension_numbers=dn)
    y = jnp.maximum(y + c2b[None, :, None, None], 0.0)
    y = lax.reduce_window(y, -jnp.inf, lax.max, (1, 1, 2, 2), (1, 1, 2, 2), 'VALID')
    f = y.reshape(y.shape[0], -1)
    h = jnp.maximum(f @ f1w.T + f1b, 0.0)
    h = jnp.maximum(h @ f2w.T + f2b, 0.0)
    return h @ f3w.T + f3b


# ----------------------------------------------------------------- main
if __name__ == "__main__":
    key = jax.random.PRNGKey(0)
    keys = jax.random.split(key, 11)
    N = 2
    # Net's forward implies 1-channel 32x32 inputs (LeNet-5): conv(5)->pool->conv(5)->pool -> 16*5*5
    x = jax.random.normal(keys[0], (N, 1, 32, 32), dtype=jnp.float32)

    params = (
        jax.random.normal(keys[1], (6, 1, 5, 5), jnp.float32) * 0.20,   # conv1.weight
        jax.random.normal(keys[2], (6,), jnp.float32) * 0.10,           # conv1.bias
        jax.random.normal(keys[3], (16, 6, 5, 5), jnp.float32) * 0.08,  # conv2.weight
        jax.random.normal(keys[4], (16,), jnp.float32) * 0.10,          # conv2.bias
        jax.random.normal(keys[5], (120, 400), jnp.float32) * 0.05,     # fc1.weight
        jax.random.normal(keys[6], (120,), jnp.float32) * 0.05,         # fc1.bias
        jax.random.normal(keys[7], (84, 120), jnp.float32) * 0.09,      # fc2.weight
        jax.random.normal(keys[8], (84,), jnp.float32) * 0.05,          # fc2.bias
        jax.random.normal(keys[9], (10, 84), jnp.float32) * 0.10,       # fc3.weight
        jax.random.normal(keys[10], (10,), jnp.float32) * 0.05,         # fc3.bias
    )

    kparams = prepare_params(params)        # one-time constant preprocessing (hoisted)

    out = jax.block_until_ready(net_forward(x, kparams))
    ref = jax.block_until_ready(ref_forward(x, params))

    assert out.shape == (N, 10) and out.dtype == jnp.float32
    if not np.allclose(np.asarray(out), np.asarray(ref), atol=3e-2, rtol=3e-2):
        err = float(jnp.max(jnp.abs(out - ref)))
        raise AssertionError(f"Pallas output mismatch vs reference, max abs err = {err}")

    print("KERNEL_OK")
</pallas_src>

<mosaic_0001>
module attributes {stable_mosaic.version = 11 : i64} {
  func.func @_lenet_kernel(%arg0: i32, %arg1: memref<32x8x32xf32, #tpu.memory_space<vmem>>, %arg2: memref<160x256xf32, #tpu.memory_space<vmem>>, %arg3: memref<640x256xf32, #tpu.memory_space<vmem>>, %arg4: memref<640x120xf32, #tpu.memory_space<vmem>>, %arg5: memref<120x84xf32, #tpu.memory_space<vmem>>, %arg6: memref<84x128xf32, #tpu.memory_space<vmem>>, %arg7: memref<8x256xf32, #tpu.memory_space<vmem>>, %arg8: memref<8x128xf32, #tpu.memory_space<vmem>>) attributes {dimension_semantics = [#tpu.dimension_semantics<parallel>], iteration_bounds = array<i64: 1>, scalar_prefetch = 0 : i64, scratch_operands = 0 : i64, tpu.core_type = #tpu.core_type<tc>, window_params = [{transform_indices = @transform_0, window_bounds = array<i64: 32, 8, 32>}, {pipeline_mode = #tpu.pipeline_mode<synchronous>, transform_indices = @transform_1, window_bounds = array<i64: 160, 256>}, {pipeline_mode = #tpu.pipeline_mode<synchronous>, transform_indices = @transform_2, window_bounds = array<i64: 640, 256>}, {pipeline_mode = #tpu.pipeline_mode<synchronous>, transform_indices = @transform_3, window_bounds = array<i64: 640, 120>}, {pipeline_mode = #tpu.pipeline_mode<synchronous>, transform_indices = @transform_4, window_bounds = array<i64: 120, 84>}, {pipeline_mode = #tpu.pipeline_mode<synchronous>, transform_indices = @transform_5, window_bounds = array<i64: 84, 128>}, {pipeline_mode = #tpu.pipeline_mode<synchronous>, transform_indices = @transform_6, window_bounds = array<i64: 8, 256>}, {transform_indices = @transform_7, window_bounds = array<i64: 8, 128>}]} {
    %c0 = arith.constant 0 : index
    %c0_0 = arith.constant 0 : index
    %0 = vector.load %arg7[%c0, %c0_0] : memref<8x256xf32, #tpu.memory_space<vmem>>, vector<8x256xf32>
    %c0_1 = arith.constant 0 : index
    %c0_2 = arith.constant 0 : index
    %c0_3 = arith.constant 0 : index
    %1 = vector.load %arg1[%c0_1, %c0_2, %c0_3] : memref<32x8x32xf32, #tpu.memory_space<vmem>>, vector<32x8x32xf32>
    %cst = arith.constant 0.000000e+00 : f32
    %2 = vector.broadcast %cst : f32 to vector<224x256xf32>
    %3 = vector.extract_strided_slice %1 {offsets = [0, 0, 0], sizes = [28, 8, 32], strides = [1, 1, 1]} : vector<32x8x32xf32> to vector<28x8x32xf32>
    %4 = vector.shape_cast %3 : vector<28x8x32xf32> to vector<224x32xf32>
    %c0_4 = arith.constant 0 : index
    %c0_5 = arith.constant 0 : index
    %5 = vector.load %arg2[%c0_4, %c0_5] : memref<160x256xf32, #tpu.memory_space<vmem>>, vector<32x256xf32>
    %cst_6 = arith.constant dense<0.000000e+00> : vector<224x256xf32>
    %6 = tpu.matmul %4, %5, %cst_6 {dimension_numbers = #tpu.dot_dimension_numbers<[1], [0], [0], [1], [0, 0, 1, 1], [], []>} : vector<224x32xf32>, vector<32x256xf32>, vector<224x256xf32> -> vector<224x256xf32>
    %7 = arith.addf %2, %6 : vector<224x256xf32>
    %8 = vector.extract_strided_slice %1 {offsets = [1, 0, 0], sizes = [28, 8, 32], strides = [1, 1, 1]} : vector<32x8x32xf32> to vector<28x8x32xf32>
    %9 = vector.shape_cast %8 : vector<28x8x32xf32> to vector<224x32xf32>
    %c32 = arith.constant 32 : index
    %c0_7 = arith.constant 0 : index
    %10 = vector.load %arg2[%c32, %c0_7] : memref<160x256xf32, #tpu.memory_space<vmem>>, vector<32x256xf32>
    %cst_8 = arith.constant dense<0.000000e+00> : vector<224x256xf32>
    %11 = tpu.matmul %9, %10, %cst_8 {dimension_numbers = #tpu.dot_dimension_numbers<[1], [0], [0], [1], [0, 0, 1, 1], [], []>} : vector<224x32xf32>, vector<32x256xf32>, vector<224x256xf32> -> vector<224x256xf32>
    %12 = arith.addf %7, %11 : vector<224x256xf32>
    %13 = vector.extract_strided_slice %1 {offsets = [2, 0, 0], sizes = [28, 8, 32], strides = [1, 1, 1]} : vector<32x8x32xf32> to vector<28x8x32xf32>
    %14 = vector.shape_cast %13 : vector<28x8x32xf32> to vector<224x32xf32>
    %c64 = arith.constant 64 : index
    %c0_9 = arith.constant 0 : index
    %15 = vector.load %arg2[%c64, %c0_9] : memref<160x256xf32, #tpu.memory_space<vmem>>, vector<32x256xf32>
    %cst_10 = arith.constant dense<0.000000e+00> : vector<224x256xf32>
    %16 = tpu.matmul %14, %15, %cst_10 {dimension_numbers = #tpu.dot_dimension_numbers<[1], [0], [0], [1], [0, 0, 1, 1], [], []>} : vector<224x32xf32>, vector<32x256xf32>, vector<224x256xf32> -> vector<224x256xf32>
    %17 = arith.addf %12, %16 : vector<224x256xf32>
    %18 = vector.extract_strided_slice %1 {offsets = [3, 0, 0], sizes = [28, 8, 32], strides = [1, 1, 1]} : vector<32x8x32xf32> to vector<28x8x32xf32>
    %19 = vector.shape_cast %18 : vector<28x8x32xf32> to vector<224x32xf32>
    %c96 = arith.constant 96 : index
    %c0_11 = arith.constant 0 : index
    %20 = vector.load %arg2[%c96, %c0_11] : memref<160x256xf32, #tpu.memory_space<vmem>>, vector<32x256xf32>
    %cst_12 = arith.constant dense<0.000000e+00> : vector<224x256xf32>
    %21 = tpu.matmul %19, %20, %cst_12 {dimension_numbers = #tpu.dot_dimension_numbers<[1], [0], [0], [1], [0, 0, 1, 1], [], []>} : vector<224x32xf32>, vector<32x256xf32>, vector<224x256xf32> -> vector<224x256xf32>
    %22 = arith.addf %17, %21 : vector<224x256xf32>
    %23 = vector.extract_strided_slice %1 {offsets = [4, 0, 0], sizes = [28, 8, 32], strides = [1, 1, 1]} : vector<32x8x32xf32> to vector<28x8x32xf32>
    %24 = vector.shape_cast %23 : vector<28x8x32xf32> to vector<224x32xf32>
    %c128 = arith.constant 128 : index
    %c0_13 = arith.constant 0 : index
    %25 = vector.load %arg2[%c128, %c0_13] : memref<160x256xf32, #tpu.memory_space<vmem>>, vector<32x256xf32>
    %cst_14 = arith.constant dense<0.000000e+00> : vector<224x256xf32>
    %26 = tpu.matmul %24, %25, %cst_14 {dimension_numbers = #tpu.dot_dimension_numbers<[1], [0], [0], [1], [0, 0, 1, 1], [], []>} : vector<224x32xf32>, vector<32x256xf32>, vector<224x256xf32> -> vector<224x256xf32>
    %27 = arith.addf %22, %26 : vector<224x256xf32>
    %28 = vector.extract_strided_slice %0 {offsets = [0, 0], sizes = [1, 256], strides = [1, 1]} : vector<8x256xf32> to vector<1x256xf32>
    %29 = vector.broadcast %28 : vector<1x256xf32> to vector<224x256xf32>
    %30 = arith.addf %27, %29 : vector<224x256xf32>
    %cst_15 = arith.constant 0.000000e+00 : f32
    %31 = vector.broadcast %cst_15 : f32 to vector<224x256xf32>
    %32 = arith.maximumf %30, %31 : vector<224x256xf32>
    %33 = vector.extract_strided_slice %32 {offsets = [0, 0], sizes = [224, 128], strides = [1, 1]} : vector<224x256xf32> to vector<224x128xf32>
    %34 = vector.extract_strided_slice %32 {offsets = [0, 128], sizes = [224, 128], strides = [1, 1]} : vector<224x256xf32> to vector<224x128xf32>
    %35 = arith.maximumf %33, %34 : vector<224x128xf32>
    %36 = vector.shape_cast %35 : vector<224x128xf32> to vector<14x2x8x128xf32>
    %37 = vector.extract_strided_slice %36 {offsets = [0, 0, 0, 0], sizes = [14, 1, 8, 128], strides = [1, 1, 1, 1]} : vector<14x2x8x128xf32> to vector<14x1x8x128xf32>
    %38 = vector.shape_cast %37 : vector<14x1x8x128xf32> to vector<14x8x128xf32>
    %39 = vector.extract_strided_slice %36 {offsets = [0, 1, 0, 0], sizes = [14, 1, 8, 128], strides = [1, 1, 1, 1]} : vector<14x2x8x128xf32> to vector<14x1x8x128xf32>
    %40 = vector.shape_cast %39 : vector<14x1x8x128xf32> to vector<14x8x128xf32>
    %41 = arith.maximumf %38, %40 : vector<14x8x128xf32>
    %cst_16 = arith.constant 0.000000e+00 : f32
    %42 = vector.broadcast %cst_16 : f32 to vector<80x256xf32>
    %43 = vector.extract_strided_slice %41 {offsets = [0, 0, 0], sizes = [10, 8, 128], strides = [1, 1, 1]} : vector<14x8x128xf32> to vector<10x8x128xf32>
    %44 = vector.shape_cast %43 : vector<10x8x128xf32> to vector<80x128xf32>
    %c0_17 = arith.constant 0 : index
    %c0_18 = arith.constant 0 : index
    %45 = vector.load %arg3[%c0_17, %c0_18] : memref<640x256xf32, #tpu.memory_space<vmem>>, vector<128x256xf32>
    %cst_19 = arith.constant dense<0.000000e+00> : vector<80x256xf32>
    %46 = tpu.matmul %44, %45, %cst_19 {dimension_numbers = #tpu.dot_dimension_numbers<[1], [0], [0], [1], [0, 0, 1, 1], [], []>} : vector<80x128xf32>, vector<128x256xf32>, vector<80x256xf32> -> vector<80x256xf32>
    %47 = arith.addf %42, %46 : vector<80x256xf32>
    %48 = vector.extract_strided_slice %41 {offsets = [1, 0, 0], sizes = [10, 8, 128], strides = [1, 1, 1]} : vector<14x8x128xf32> to vector<10x8x128xf32>
    %49 = vector.shape_cast %48 : vector<10x8x128xf32> to vector<80x128xf32>
    %c128_20 = arith.constant 128 : index
    %c0_21 = arith.constant 0 : index
    %50 = vector.load %arg3[%c128_20, %c0_21] : memref<640x256xf32, #tpu.memory_space<vmem>>, vector<128x256xf32>
    %cst_22 = arith.constant dense<0.000000e+00> : vector<80x256xf32>
    %51 = tpu.matmul %49, %50, %cst_22 {dimension_numbers = #tpu.dot_dimension_numbers<[1], [0], [0], [1], [0, 0, 1, 1], [], []>} : vector<80x128xf32>, vector<128x256xf32>, vector<80x256xf32> -> vector<80x256xf32>
    %52 = arith.addf %47, %51 : vector<80x256xf32>
    %53 = vector.extract_strided_slice %41 {offsets = [2, 0, 0], sizes = [10, 8, 128], strides = [1, 1, 1]} : vector<14x8x128xf32> to vector<10x8x128xf32>
    %54 = vector.shape_cast %53 : vector<10x8x128xf32> to vector<80x128xf32>
    %c256 = arith.constant 256 : index
    %c0_23 = arith.constant 0 : index
    %55 = vector.load %arg3[%c256, %c0_23] : memref<640x256xf32, #tpu.memory_space<vmem>>, vector<128x256xf32>
    %cst_24 = arith.constant dense<0.000000e+00> : vector<80x256xf32>
    %56 = tpu.matmul %54, %55, %cst_24 {dimension_numbers = #tpu.dot_dimension_numbers<[1], [0], [0], [1], [0, 0, 1, 1], [], []>} : vector<80x128xf32>, vector<128x256xf32>, vector<80x256xf32> -> vector<80x256xf32>
    %57 = arith.addf %52, %56 : vector<80x256xf32>
    %58 = vector.extract_strided_slice %41 {offsets = [3, 0, 0], sizes = [10, 8, 128], strides = [1, 1, 1]} : vector<14x8x128xf32> to vector<10x8x128xf32>
    %59 = vector.shape_cast %58 : vector<10x8x128xf32> to vector<80x128xf32>
    %c384 = arith.constant 384 : index
    %c0_25 = arith.constant 0 : index
    %60 = vector.load %arg3[%c384, %c0_25] : memref<640x256xf32, #tpu.memory_space<vmem>>, vector<128x256xf32>
    %cst_26 = arith.constant dense<0.000000e+00> : vector<80x256xf32>
    %61 = tpu.matmul %59, %60, %cst_26 {dimension_numbers = #tpu.dot_dimension_numbers<[1], [0], [0], [1], [0, 0, 1, 1], [], []>} : vector<80x128xf32>, vector<128x256xf32>, vector<80x256xf32> -> vector<80x256xf32>
    %62 = arith.addf %57, %61 : vector<80x256xf32>
    %63 = vector.extract_strided_slice %41 {offsets = [4, 0, 0], sizes = [10, 8, 128], strides = [1, 1, 1]} : vector<14x8x128xf32> to vector<10x8x128xf32>
    %64 = vector.shape_cast %63 : vector<10x8x128xf32> to vector<80x128xf32>
    %c512 = arith.constant 512 : index
    %c0_27 = arith.constant 0 : index
    %65 = vector.load %arg3[%c512, %c0_27] : memref<640x256xf32, #tpu.memory_space<vmem>>, vector<128x256xf32>
    %cst_28 = arith.constant dense<0.000000e+00> : vector<80x256xf32>
    %66 = tpu.matmul %64, %65, %cst_28 {dimension_numbers = #tpu.dot_dimension_numbers<[1], [0], [0], [1], [0, 0, 1, 1], [], []>} : vector<80x128xf32>, vector<128x256xf32>, vector<80x256xf32> -> vector<80x256xf32>
    %67 = arith.addf %62, %66 : vector<80x256xf32>
    %68 = vector.extract_strided_slice %0 {offsets = [1, 0], sizes = [1, 256], strides = [1, 1]} : vector<8x256xf32> to vector<1x256xf32>
    %69 = vector.broadcast %68 : vector<1x256xf32> to vector<80x256xf32>
    %70 = arith.addf %67, %69 : vector<80x256xf32>
    %cst_29 = arith.constant 0.000000e+00 : f32
    %71 = vector.broadcast %cst_29 : f32 to vector<80x256xf32>
    %72 = arith.maximumf %70, %71 : vector<80x256xf32>
    %73 = vector.extract_strided_slice %72 {offsets = [0, 0], sizes = [80, 128], strides = [1, 1]} : vector<80x256xf32> to vector<80x128xf32>
    %74 = vector.extract_strided_slice %72 {offsets = [0, 128], sizes = [80, 128], strides = [1, 1]} : vector<80x256xf32> to vector<80x128xf32>
    %75 = arith.maximumf %73, %74 : vector<80x128xf32>
    %76 = vector.shape_cast %75 : vector<80x128xf32> to vector<5x2x8x128xf32>
    %77 = vector.extract_strided_slice %76 {offsets = [0, 0, 0, 0], sizes = [5, 1, 8, 128], strides = [1, 1, 1, 1]} : vector<5x2x8x128xf32> to vector<5x1x8x128xf32>
    %78 = vector.shape_cast %77 : vector<5x1x8x128xf32> to vector<5x8x128xf32>
    %79 = vector.extract_strided_slice %76 {offsets = [0, 1, 0, 0], sizes = [5, 1, 8, 128], strides = [1, 1, 1, 1]} : vector<5x2x8x128xf32> to vector<5x1x8x128xf32>
    %80 = vector.shape_cast %79 : vector<5x1x8x128xf32> to vector<5x8x128xf32>
    %81 = arith.maximumf %78, %80 : vector<5x8x128xf32>
    %cst_30 = arith.constant 0.000000e+00 : f32
    %82 = vector.broadcast %cst_30 : f32 to vector<8x120xf32>
    %83 = vector.extract_strided_slice %81 {offsets = [0, 0, 0], sizes = [1, 8, 128], strides = [1, 1, 1]} : vector<5x8x128xf32> to vector<1x8x128xf32>
    %84 = vector.shape_cast %83 : vector<1x8x128xf32> to vector<8x128xf32>
    %c0_31 = arith.constant 0 : index
    %c0_32 = arith.constant 0 : index
    %85 = vector.load %arg4[%c0_31, %c0_32] : memref<640x120xf32, #tpu.memory_space<vmem>>, vector<128x120xf32>
    %cst_33 = arith.constant dense<0.000000e+00> : vector<8x120xf32>
    %86 = tpu.matmul %84, %85, %cst_33 {dimension_numbers = #tpu.dot_dimension_numbers<[1], [0], [0], [1], [0, 0, 1, 1], [], []>} : vector<8x128xf32>, vector<128x120xf32>, vector<8x120xf32> -> vector<8x120xf32>
    %87 = arith.addf %82, %86 : vector<8x120xf32>
    %88 = vector.extract_strided_slice %81 {offsets = [1, 0, 0], sizes = [1, 8, 128], strides = [1, 1, 1]} : vector<5x8x128xf32> to vector<1x8x128xf32>
    %89 = vector.shape_cast %88 : vector<1x8x128xf32> to vector<8x128xf32>
    %c128_34 = arith.constant 128 : index
    %c0_35 = arith.constant 0 : index
    %90 = vector.load %arg4[%c128_34, %c0_35] : memref<640x120xf32, #tpu.memory_space<vmem>>, vector<128x120xf32>
    %cst_36 = arith.constant dense<0.000000e+00> : vector<8x120xf32>
    %91 = tpu.matmul %89, %90, %cst_36 {dimension_numbers = #tpu.dot_dimension_numbers<[1], [0], [0], [1], [0, 0, 1, 1], [], []>} : vector<8x128xf32>, vector<128x120xf32>, vector<8x120xf32> -> vector<8x120xf32>
    %92 = arith.addf %87, %91 : vector<8x120xf32>
    %93 = vector.extract_strided_slice %81 {offsets = [2, 0, 0], sizes = [1, 8, 128], strides = [1, 1, 1]} : vector<5x8x128xf32> to vector<1x8x128xf32>
    %94 = vector.shape_cast %93 : vector<1x8x128xf32> to vector<8x128xf32>
    %c256_37 = arith.constant 256 : index
    %c0_38 = arith.constant 0 : index
    %95 = vector.load %arg4[%c256_37, %c0_38] : memref<640x120xf32, #tpu.memory_space<vmem>>, vector<128x120xf32>
    %cst_39 = arith.constant dense<0.000000e+00> : vector<8x120xf32>
    %96 = tpu.matmul %94, %95, %cst_39 {dimension_numbers = #tpu.dot_dimension_numbers<[1], [0], [0], [1], [0, 0, 1, 1], [], []>} : vector<8x128xf32>, vector<128x120xf32>, vector<8x120xf32> -> vector<8x120xf32>
    %97 = arith.addf %92, %96 : vector<8x120xf32>
    %98 = vector.extract_strided_slice %81 {offsets = [3, 0, 0], sizes = [1, 8, 128], strides = [1, 1, 1]} : vector<5x8x128xf32> to vector<1x8x128xf32>
    %99 = vector.shape_cast %98 : vector<1x8x128xf32> to vector<8x128xf32>
    %c384_40 = arith.constant 384 : index
    %c0_41 = arith.constant 0 : index
    %100 = vector.load %arg4[%c384_40, %c0_41] : memref<640x120xf32, #tpu.memory_space<vmem>>, vector<128x120xf32>
    %cst_42 = arith.constant dense<0.000000e+00> : vector<8x120xf32>
    %101 = tpu.matmul %99, %100, %cst_42 {dimension_numbers = #tpu.dot_dimension_numbers<[1], [0], [0], [1], [0, 0, 1, 1], [], []>} : vector<8x128xf32>, vector<128x120xf32>, vector<8x120xf32> -> vector<8x120xf32>
    %102 = arith.addf %97, %101 : vector<8x120xf32>
    %103 = vector.extract_strided_slice %81 {offsets = [4, 0, 0], sizes = [1, 8, 128], strides = [1, 1, 1]} : vector<5x8x128xf32> to vector<1x8x128xf32>
    %104 = vector.shape_cast %103 : vector<1x8x128xf32> to vector<8x128xf32>
    %c512_43 = arith.constant 512 : index
    %c0_44 = arith.constant 0 : index
    %105 = vector.load %arg4[%c512_43, %c0_44] : memref<640x120xf32, #tpu.memory_space<vmem>>, vector<128x120xf32>
    %cst_45 = arith.constant dense<0.000000e+00> : vector<8x120xf32>
    %106 = tpu.matmul %104, %105, %cst_45 {dimension_numbers = #tpu.dot_dimension_numbers<[1], [0], [0], [1], [0, 0, 1, 1], [], []>} : vector<8x128xf32>, vector<128x120xf32>, vector<8x120xf32> -> vector<8x120xf32>
    %107 = arith.addf %102, %106 : vector<8x120xf32>
    %108 = vector.extract_strided_slice %0 {offsets = [2, 0], sizes = [1, 120], strides = [1, 1]} : vector<8x256xf32> to vector<1x120xf32>
    %109 = vector.broadcast %108 : vector<1x120xf32> to vector<8x120xf32>
    %110 = arith.addf %107, %109 : vector<8x120xf32>
    %cst_46 = arith.constant 0.000000e+00 : f32
    %111 = vector.broadcast %cst_46 : f32 to vector<8x120xf32>
    %112 = arith.maximumf %110, %111 : vector<8x120xf32>
    %c0_47 = arith.constant 0 : index
    %c0_48 = arith.constant 0 : index
    %113 = vector.load %arg5[%c0_47, %c0_48] : memref<120x84xf32, #tpu.memory_space<vmem>>, vector<120x84xf32>
    %cst_49 = arith.constant dense<0.000000e+00> : vector<8x84xf32>
    %114 = tpu.matmul %112, %113, %cst_49 {dimension_numbers = #tpu.dot_dimension_numbers<[1], [0], [0], [1], [0, 0, 1, 1], [], []>} : vector<8x120xf32>, vector<120x84xf32>, vector<8x84xf32> -> vector<8x84xf32>
    %115 = vector.extract_strided_slice %0 {offsets = [3, 0], sizes = [1, 84], strides = [1, 1]} : vector<8x256xf32> to vector<1x84xf32>
    %116 = vector.broadcast %115 : vector<1x84xf32> to vector<8x84xf32>
    %117 = arith.addf %114, %116 : vector<8x84xf32>
    %cst_50 = arith.constant 0.000000e+00 : f32
    %118 = vector.broadcast %cst_50 : f32 to vector<8x84xf32>
    %119 = arith.maximumf %117, %118 : vector<8x84xf32>
    %c0_51 = arith.constant 0 : index
    %c0_52 = arith.constant 0 : index
    %120 = vector.load %arg6[%c0_51, %c0_52] : memref<84x128xf32, #tpu.memory_space<vmem>>, vector<84x128xf32>
    %cst_53 = arith.constant dense<0.000000e+00> : vector<8x128xf32>
    %121 = tpu.matmul %119, %120, %cst_53 {dimension_numbers = #tpu.dot_dimension_numbers<[1], [0], [0], [1], [0, 0, 1, 1], [], []>} : vector<8x84xf32>, vector<84x128xf32>, vector<8x128xf32> -> vector<8x128xf32>
    %122 = vector.extract_strided_slice %0 {offsets = [4, 0], sizes = [1, 128], strides = [1, 1]} : vector<8x256xf32> to vector<1x128xf32>
    %123 = vector.broadcast %122 : vector<1x128xf32> to vector<8x128xf32>
    %124 = arith.addf %121, %123 : vector<8x128xf32>
    %c0_54 = arith.constant 0 : index
    %c0_55 = arith.constant 0 : index
    %125 = vector.load %arg8[%c0_54, %c0_55] : memref<8x128xf32, #tpu.memory_space<vmem>>, vector<8x128xf32>
    tpu.vector_store %arg8[%c0_54, %c0_55], %124 {strides = array<i32>} : memref<8x128xf32, #tpu.memory_space<vmem>>, vector<8x128xf32>,
    return
  }
  func.func @transform_0(%arg0: i32) -> (i32, i32, i32) {
    %c0_i32 = arith.constant 0 : i32
    %c0_i32_0 = arith.constant 0 : i32
    %c0_i32_1 = arith.constant 0 : i32
    return %c0_i32, %arg0, %c0_i32_0 : i32, i32, i32
  }
  func.func @transform_1(%arg0: i32) -> (i32, i32) {
    %c0_i32 = arith.constant 0 : i32
    %c0_i32_0 = arith.constant 0 : i32
    %c0_i32_1 = arith.constant 0 : i32
    return %c0_i32, %c0_i32_0 : i32, i32
  }
  func.func @transform_2(%arg0: i32) -> (i32, i32) {
    %c0_i32 = arith.constant 0 : i32
    %c0_i32_0 = arith.constant 0 : i32
    %c0_i32_1 = arith.constant 0 : i32
    return %c0_i32, %c0_i32_0 : i32, i32
  }
  func.func @transform_3(%arg0: i32) -> (i32, i32) {
    %c0_i32 = arith.constant 0 : i32
    %c0_i32_0 = arith.constant 0 : i32
    %c0_i32_1 = arith.constant 0 : i32
    return %c0_i32, %c0_i32_0 : i32, i32
  }
  func.func @transform_4(%arg0: i32) -> (i32, i32) {
    %c0_i32 = arith.constant 0 : i32
    %c0_i32_0 = arith.constant 0 : i32
    %c0_i32_1 = arith.constant 0 : i32
    return %c0_i32, %c0_i32_0 : i32, i32
  }
  func.func @transform_5(%arg0: i32) -> (i32, i32) {
    %c0_i32 = arith.constant 0 : i32
    %c0_i32_0 = arith.constant 0 : i32
    %c0_i32_1 = arith.constant 0 : i32
    return %c0_i32, %c0_i32_0 : i32, i32
  }
  func.func @transform_6(%arg0: i32) -> (i32, i32) {
    %c0_i32 = arith.constant 0 : i32
    %c0_i32_0 = arith.constant 0 : i32
    %c0_i32_1 = arith.constant 0 : i32
    return %c0_i32, %c0_i32_0 : i32, i32
  }
  func.func @transform_7(%arg0: i32) -> (i32, i32) {
    %c0_i32 = arith.constant 0 : i32
    %c0_i32_0 = arith.constant 0 : i32
    return %arg0, %c0_i32 : i32, i32
  }
}

</mosaic_0001>

<bundles_post_ra>
// kernel: net_forward.1
= control target key start
LH: loop header
LB: loop body
LE: loop exit
PB: predicated region body
PF: predicated region fallthrough
CT: control target
= control target key end

     0   :  { %12 = vsyncpa [#allocation3], 0  ;;  %s6373_s0 = inlined_call_operand.vmem [shape: f32[32,8,32], index: 0, kind: input, shape index: {}]   ;;  %s6374_s1 = inlined_call_operand.hbm [shape: f32[160,256], index: 1, kind: input, shape index: {}]   ;;  %s6375_s2 = inlined_call_operand.vmem [shape: f32[640,256], index: 2, kind: input, shape index: {}]   ;;  %s6376_s3 = inlined_call_operand.vmem [shape: f32[640,120], index: 3, kind: input, shape index: {}]   ;;  %s6377_s4 = inlined_call_operand.vmem [shape: f32[120,84], index: 4, kind: input, shape index: {}]   ;;  %s6378_s5 = inlined_call_operand.hbm [shape: f32[84,128], index: 5, kind: input, shape index: {}]   ;;  %s6379_s6 = inlined_call_operand.vmem [shape: f32[8,256], index: 6, kind: input, shape index: {}]   ;;  %s6380_s7 = inlined_call_operand.vmem [shape: f32[8,128], index: 7, kind: output, shape index: {}]  }
   0x1   :  { %13 = vsyncpa [#allocation5], 0  ;;  %s4473_s24 = smov [#allocation2]   ;;  %s4425_s28 = scalar_lea.hbm %s6374_s1, 5120 }
   0x2   :  { %s21_s25 = sshll.u32 %s4473_s24, 4  ;;  %p4426_p0 = scmp.ne.s32.totalorder %s6374_s1, %s4425_s28  ;;  %s22_s25 = int_to_ptr.vmem [resolvable:$true] %s21_s25 }
   0x3   :  { %p4429_p1 = scmp.lt.u32.totalorder %s4425_s28, %s6374_s1 }
   0x5   :  { %p4431_p2 = pnand %p4429_p1, %p4426_p0 }
   0x7   :  { %4434 = shalt.err (!%p4431_p2)
}
   0x8   :  { %s4435_s10 = scalar_lea.vmem %s22_s25, 5120  ;;  %p4440_p4 = scmp.lt.s32.totalorder %s22_s25, %s22_s25 }
   0x9   :  { %p4436_p3 = scmp.ne.s32.totalorder %s22_s25, %s4435_s10  ;;  %p4441_p5 = scmp.lt.s32.totalorder %s4435_s10, %s4435_s10 }
   0xb   :  { %p4442_p6 = por %p4441_p5, %p4440_p4 }
   0xd   :  { %p4443_p7 = pnand %p4442_p6, %p4436_p3 }
   0xf   :  { %4446 = shalt.err (!%p4443_p7)
}
  0x10   :  { %s4474_s11 = smov 256   ;;  %s4475_s12 = smov 16  }
  0x11   :  { %27 = dma.hbm_to_vmem [thread:$0]  %s6374_s1, 5120, %s22_s25, [#allocation3], %s4474_s11, %s4474_s11, %s4475_s12  }
  0x12   :  { %s4476_s15 = smov [#allocation4]   ;;  %s4447_s19 = scalar_lea.hbm %s6378_s5, 1408 }
  0x13   :  { %s39_s16 = sshll.u32 %s4476_s15, 4  ;;  %p4448_p8 = scmp.ne.s32.totalorder %s6378_s5, %s4447_s19  ;;  %s40_s16 = int_to_ptr.vmem [resolvable:$true] %s39_s16 }
  0x14   :  { %p4451_p9 = scmp.lt.u32.totalorder %s4447_s19, %s6378_s5 }
  0x16   :  { %p4453_p10 = pnand %p4451_p9, %p4448_p8 }
  0x18   :  { %4456 = shalt.err (!%p4453_p10)
}
  0x19   :  { %s4457_s24 = scalar_lea.vmem %s40_s16, 1408  ;;  %p4462_p12 = scmp.lt.s32.totalorder %s40_s16, %s40_s16 }
  0x1a   :  { %p4458_p11 = scmp.ne.s32.totalorder %s40_s16, %s4457_s24  ;;  %p4463_p13 = scmp.lt.s32.totalorder %s4457_s24, %s4457_s24 }
  0x1c   :  { %p4464_p0 = por %p4463_p13, %p4462_p12 }
  0x1e   :  { %p4465_p1 = pnand %p4464_p0, %p4458_p11 }
  0x20   :  { %4468 = shalt.err (!%p4465_p1)
}
  0x21   :  { %s4477_s1 = smov 128   ;;  %s4478_s25 = smov 8  }
  0x22   :  { %45 = dma.hbm_to_vmem [thread:$0]  %s6378_s5, 1408, %s40_s16, [#allocation5], %s4477_s1, %s4477_s1, %s4478_s25  }
  0x23   :  { %4469 = dma.done.wait [#allocation3], 5120  }
  0x24   :  { %4470 = vsyncadd [#allocation3], 4294962176 }
  0x25   :  { %4471 = dma.done.wait [#allocation5], 1408  }
  0x26   :  { %4472 = vsyncadd [#allocation5], 4294965888  ;;  %v6381_v0 = vmov 0.0   ;;  %v97_v1 = vld [vmem:[#allocation2 + $0x48] sm:$0xff]  ;;  %v99_v2 = vld [vmem:[#allocation2 + $0x58] sm:$0xff]  ;;  %vm104_vm0 = vcmask 261120  }
  0x27   :  { %253 = vmatprep.mubr.f32.mxu0 %v6381_v0  ;;  %289 = vmatprep.mubr.f32.mxu1 %v6381_v0  ;;  %v96_v3 = vld [vmem:[#allocation2 + $0x40] sm:$0xff]  ;;  %v3750_v4 = vpack.c.bf16 %v99_v2, %v97_v1  ;;  %v98_v5 = vld [vmem:[#allocation2 + $0x50] sm:$0xff]  ;;  %v101_v6 = vld [vmem:[#allocation2 + $0x68] sm:$0xff]  ;;  %vm4481_vm1 = vmmov 0   ;;  %vm3086_vm2 = vcmask 982016   ;;  %vm3180_vm3 = vcmask 1043456  }
  0x28   :  { %v103_v7 = vld [vmem:[#allocation2 + $0x78] sm:$0xff]  ;;  %v3752_v8 = vpack.c.bf16 %v98_v5, %v96_v3  ;;  %v100_v10 = vld [vmem:[#allocation2 + $0x60] sm:$0xff]  ;;  %v102_v11 = vld [vmem:[#allocation2 + $0x70] sm:$0xff]  ;;  %vm3176_vm4 = vcmask 687104  }
  0x29   :  { %v3754_v9 = vpack.c.bf16 %v103_v7, %v101_v6  ;;  %3751 = vmatprep.subr.bf16.mxu0 %v3750_v4  ;;  %v89_v12 = vld [vmem:[#allocation2 + $0x8] sm:$0xff]  ;;  %v91_v13 = vld [vmem:[#allocation2 + $0x18] sm:$0xff]  ;;  %4106 = vmatprep.subr.bf16.mxu1 %v3750_v4  ;;  %v3756_v14 = vpack.c.bf16 %v102_v11, %v100_v10  ;;  %v88_v16 = vld [vmem:[#allocation2] sm:$0xff] }
  0x2a   :  { %3753 = vmatpush1.bf16.msra.mxu0 %v3752_v8  ;;  %4108 = vmatpush1.bf16.msra.mxu1 %v3752_v8  ;;  %v3758_v15 = vpack.c.bf16 %v91_v13, %v89_v12  ;;  %v90_v17 = vld [vmem:[#allocation2 + $0x10] sm:$0xff]  ;;  %v93_v18 = vld [vmem:[#allocation2 + $0x28] sm:$0xff]  ;;  %v95_v19 = vld [vmem:[#allocation2 + $0x38] sm:$0xff] }
  0x2b   :  { %3755 = vmatprep.subr.bf16.mxu0 %v3754_v9  ;;  %4107 = vmatprep.subr.bf16.mxu1 %v3754_v9  ;;  %v4551_v20 = vld [vmem:[%s6373_s0 + $0x8] sm:$0xff]  ;;  %v3760_v21 = vpack.c.bf16 %v90_v17, %v88_v16  ;;  %v3762_v22 = vpack.c.bf16 %v95_v19, %v93_v18  ;;  %v92_v23 = vld [vmem:[#allocation2 + $0x20] sm:$0xff]  ;;  %v94_v24 = vld [vmem:[#allocation2 + $0x30] sm:$0xff] }
  0x2c   :  { %v659_v25 = vld [vmem:[#allocation2 + $0x88] sm:$0xff]  ;;  %v661_v26 = vld [vmem:[#allocation2 + $0x98] sm:$0xff]  ;;  %v4566_v28 = vld [vmem:[%s6373_s0 + $0x10] sm:$0xff]  ;;  %v3764_v29 = vpack.c.bf16 %v94_v24, %v92_v23 }
  0x2d   :  { %v4556_v27 = vld [vmem:[%s6373_s0 + $0x38] sm:$0xff]  ;;  %v3766_v30 = vpack.c.bf16 %v661_v26, %v659_v25  ;;  %v4572_v31 = vld [vmem:[%s6373_s0 + $0x40] sm:$0xff]  ;;  %v4588_v33 = vld [vmem:[%s6373_s0 + $0x48] sm:$0xff] }
  0x2e   :  { %3757 = vmatpush1.bf16.msra.mxu0 %v3756_v14  ;;  %4109 = vmatpush1.bf16.msra.mxu1 %v3756_v14  ;;  %v4582_v32 = vld [vmem:[%s6373_s0 + $0x18] sm:$0xff]  ;;  %v4598_v34 = vld [vmem:[%s6373_s0 + $0x20] sm:$0xff]  ;;  %v4604_v35 = vld [vmem:[%s6373_s0 + $0x50] sm:$0xff] }
  0x2f   :  { %3759 = vmatprep.subr.bf16.mxu0 %v3758_v15  ;;  %v4614_v36 = vld [vmem:[%s6373_s0 + $0x28] sm:$0xff]  ;;  %v4620_v37 = vld [vmem:[%s6373_s0 + $0x58] sm:$0xff]  ;;  %v4630_v38 = vld [vmem:[%s6373_s0 + $0x30] sm:$0xff] }
  0x30   :  { %v658_v39 = vld [vmem:[#allocation2 + $0x80] sm:$0xff]  ;;  %v660_v40 = vld [vmem:[#allocation2 + $0x90] sm:$0xff]  ;;  %v663_v42 = vld [vmem:[#allocation2 + $0xa8] sm:$0xff] }
  0x31   :  { %3261 = vmatmul.mubr.msk.f32.vlgmr.msra.gmra.mrb[0].mxu0 %vm104_vm0, %v4551_v20  ;;  %3267 = vmatmul.mubr.msk.f32.vlgmr.msra.gmra.mrb[0].mxu1 %vm104_vm0, %v4556_v27  ;;  %v4636_v41 = vld [vmem:[%s6373_s0 + $0x60] sm:$0xff]  ;;  %v665_v43 = vld [vmem:[#allocation2 + $0xb8] sm:$0xff]  ;;  %v3768_v45 = vpack.c.bf16 %v660_v40, %v658_v39  ;;  %v662_v47 = vld [vmem:[#allocation2 + $0xa0] sm:$0xff] }
  0x32   :  { %3761 = vmatpush1.bf16.msra.mxu0 %v3760_v21  ;;  %259 = vmatprep.mubr.f32.mxu0 %v6381_v0  ;;  %v56_v44 = vld [vmem:[%s6373_s0] sm:$0xff]  ;;  %v3770_v46 = vpack.c.bf16 %v665_v43, %v663_v42  ;;  %v4650_v49 = vld [vmem:[%s6373_s0 + $0x68] sm:$0xff]  ;;  %v959_v50 = vld [vmem:[#allocation2 + $0xc8] sm:$0xff] }
  0x33   :  { %3763 = vmatprep.subr.bf16.mxu0 %v3762_v22  ;;  %295 = vmatprep.mubr.f32.mxu1 %v6381_v0  ;;  %v664_v48 = vld [vmem:[#allocation2 + $0xb0] sm:$0xff]  ;;  %v961_v51 = vld [vmem:[#allocation2 + $0xd8] sm:$0xff]  ;;  %v4660_v54 = vld [vmem:[%s6373_s0 + $0x70] sm:$0xff] }
  0x34   :  { %v3772_v52 = vpack.c.bf16 %v664_v48, %v662_v47  ;;  %v3774_v53 = vpack.c.bf16 %v961_v51, %v959_v50  ;;  %v4671_v55 = vld [vmem:[%s6373_s0 + $0x78] sm:$0xff]  ;;  %v4682_v56 = vld [vmem:[%s6373_s0 + $0x80] sm:$0xff]  ;;  %v4693_v57 = vld [vmem:[%s6373_s0 + $0x88] sm:$0xff] }
  0x35   :  { %3262 = vmatmul.mubr.msk.f32.gmra.mrb[2].mxu0 %vm104_vm0, %v4566_v28  ;;  %3268 = vmatmul.mubr.msk.f32.gmra.mrb[2].mxu1 %vm104_vm0, %v4572_v31  ;;  %v4704_v58 = vld [vmem:[%s6373_s0 + $0x90] sm:$0xff]  ;;  %v4715_v59 = vld [vmem:[%s6373_s0 + $0x98] sm:$0xff]  ;;  %v4726_v60 = vld [vmem:[%s6373_s0 + $0xa0] sm:$0xff] }
  0x36   :  { %265 = vmatprep.mubr.f32.mxu0 %v6381_v0  ;;  %3765 = vmatpush1.bf16.msra.mxu0 %v3764_v29  ;;  %v4737_v61 = vld [vmem:[%s6373_s0 + $0xa8] sm:$0xff]  ;;  %v4748_v62 = vld [vmem:[%s6373_s0 + $0xb0] sm:$0xff]  ;;  %v4759_v63 = vld [vmem:[%s6373_s0 + $0xb8] sm:$0xff] }
  0x37   :  { %3767 = vmatprep.subr.bf16.mxu0 %v3766_v30  ;;  %301 = vmatprep.mubr.f32.mxu1 %v6381_v0  ;;  %v4770_v1 = vld [vmem:[%s6373_s0 + $0xc0] sm:$0xff]  ;;  %v4781_v2 = vld [vmem:[%s6373_s0 + $0xc8] sm:$0xff]  ;;  %v4792_v3 = vld [vmem:[%s6373_s0 + $0xd0] sm:$0xff] }
  0x38   :  { %v4803_v4 = vld [vmem:[%s6373_s0 + $0xd8] sm:$0xff]  ;;  %v4835_v5 = vld [vmem:[%s6373_s0 + $0xe0] sm:$0xff]  ;;  %v958_v6 = vld [vmem:[#allocation2 + $0xc0] sm:$0xff] }
  0x39   :  { %3263 = vmatmul.mubr.msk.f32.gmra.mrb[4].mxu0 %vm104_vm0, %v4582_v32  ;;  %3269 = vmatmul.mubr.msk.f32.gmra.mrb[4].mxu1 %vm104_vm0, %v4588_v33  ;;  %v960_v7 = vld [vmem:[#allocation2 + $0xd0] sm:$0xff]  ;;  %v963_v8 = vld [vmem:[#allocation2 + $0xe8] sm:$0xff]  ;;  %v965_v9 = vld [vmem:[#allocation2 + $0xf8] sm:$0xff] }
  0x3a   :  { %271 = vmatprep.mubr.f32.mxu0 %v6381_v0  ;;  %307 = vmatprep.mubr.f32.mxu1 %v6381_v0  ;;  %v3776_v10 = vpack.c.bf16 %v960_v7, %v958_v6  ;;  %v3778_v11 = vpack.c.bf16 %v965_v9, %v963_v8  ;;  %v962_v12 = vld [vmem:[#allocation2 + $0xe0] sm:$0xff]  ;;  %v964_v13 = vld [vmem:[#allocation2 + $0xf0] sm:$0xff]  ;;  %v1259_v14 = vld [vmem:[#allocation2 + $0x108] sm:$0xff] }
  0x3b   :  { %v1261_v15 = vld [vmem:[#allocation2 + $0x118] sm:$0xff]  ;;  %v3780_v16 = vpack.c.bf16 %v964_v13, %v962_v12  ;;  %v1258_v19 = vld [vmem:[#allocation2 + $0x100] sm:$0xff]  ;;  %v1263_v21 = vld [vmem:[#allocation2 + $0x128] sm:$0xff] }
  0x3c   :  { %v3782_v17 = vpack.c.bf16 %v1261_v15, %v1259_v14  ;;  %v4942_v18 = vld [vmem:[%s6373_s0 + $0xe8] sm:$0xff]  ;;  %v1262_v25 = vld [vmem:[#allocation2 + $0x120] sm:$0xff]  ;;  %v1264_v26 = vld [vmem:[#allocation2 + $0x130] sm:$0xff] }
  0x3d   :  { %3264 = vmatmul.mubr.msk.f32.gmra.mrb[6].mxu0 %vm104_vm0, %v4598_v34  ;;  %3270 = vmatmul.mubr.msk.f32.gmra.mrb[6].mxu1 %vm104_vm0, %v4604_v35  ;;  %v1265_v22 = vld [vmem:[#allocation2 + $0x138] sm:$0xff]  ;;  %v1755_v30 = vld [vmem:[%s6375_s2 + $0x118] sm:$0xff]  ;;  %v1754_v40 = vld [vmem:[%s6375_s2 + $0x110] sm:$0xff] }
  0x3e   :  { %277 = vmatprep.mubr.f32.mxu0 %v6381_v0  ;;  %313 = vmatprep.mubr.f32.mxu1 %v6381_v0  ;;  %v3786_v24 = vpack.c.bf16 %v1265_v22, %v1263_v21  ;;  %v1753_v29 = vld [vmem:[%s6375_s2 + $0x108] sm:$0xff]  ;;  %v1759_v43 = vld [vmem:[%s6375_s2 + $0x138] sm:$0xff]  ;;  %v1758_v47 = vld [vmem:[%s6375_s2 + $0x130] sm:$0xff] }
  0x3f   :  { %v3790_v39 = vpack.c.bf16 %v1755_v30, %v1753_v29  ;;  %v1757_v42 = vld [vmem:[%s6375_s2 + $0x128] sm:$0xff]  ;;  %v1763_v50 = vld [vmem:[%s6375_s2 + $0x158] sm:$0xff]  ;;  %v1762_v6 = vld [vmem:[%s6375_s2 + $0x150] sm:$0xff] }
  0x40   :  { %v1761_v48 = vld [vmem:[%s6375_s2 + $0x148] sm:$0xff]  ;;  %v5067_v8 = vld [vmem:[%s6373_s0 + $0xf0] sm:$0xff]  ;;  %v1780_v12 = vld [vmem:[%s6375_s2 + $0x1e0] sm:$0xff] }
  0x41   :  { %3265 = vmatmul.mubr.msk.f32.gmra.mrb[8].mxu0 %vm104_vm0, %v4614_v36  ;;  %3271 = vmatmul.mubr.msk.f32.gmra.mrb[8].mxu1 %vm104_vm0, %v4620_v37  ;;  %v1781_v9 = vld [vmem:[%s6375_s2 + $0x1e8] sm:$0xff]  ;;  %v87_v14 = vld [vmem:[%s6373_s0 + $0xf8] sm:$0xff] }
  0x42   :  { %283 = vmatprep.mubr.f32.mxu0 %v6381_v0  ;;  %319 = vmatprep.mubr.f32.mxu1 %v6381_v0 }
  0x43   :  { %3791 = vmatprep.subr.bf16.mxu1 %v3790_v39 }
  0x45   :  { %3266 = vmatmul.mubr.msk.f32.gmra.mrb[10].mxu0 %vm104_vm0, %v4630_v38  ;;  %3272 = vmatmul.mubr.msk.f32.gmra.mrb[10].mxu1 %vm104_vm0, %v4636_v41 }
  0x46   :  { %489 = vmatprep.mubr.f32.mxu0 %v6381_v0  ;;  %325 = vmatprep.mubr.f32.mxu1 %v6381_v0 }
  0x49   :  { %3289 = vmatmul.mubr.msk.f32.vlgmr.msra.gmra.mrb[0].mxu0 %vm104_vm0, %v56_v44  ;;  %3273 = vmatmul.mubr.msk.f32.gmra.mrb[12].mxu1 %vm104_vm0, %v4650_v49 }
  0x4a   :  { %3769 = vmatpush1.bf16.msra.mxu0 %v3768_v45  ;;  %495 = vmatprep.mubr.f32.mxu0 %v6381_v0  ;;  %v3794_v45 = vpack.c.bf16 %v1759_v43, %v1757_v42 }
  0x4b   :  { %3771 = vmatprep.subr.bf16.mxu0 %v3770_v46  ;;  %331 = vmatprep.mubr.f32.mxu1 %v6381_v0  ;;  %v1756_v46 = vld [vmem:[%s6375_s2 + $0x120] sm:$0xff] }
  0x4c   :  { %v3796_v51 = vpack.c.bf16 %v1758_v47, %v1756_v46  ;;  %v1721_v46 = vld [vmem:[%s6375_s2 + $0x8] sm:$0xff]  ;;  %v1723_v47 = vld [vmem:[%s6375_s2 + $0x18] sm:$0xff] }
  0x4d   :  { %3290 = vmatmul.mubr.msk.f32.gmra.mrb[2].mxu0 %vm104_vm0, %v4551_v20  ;;  %3274 = vmatmul.mubr.msk.f32.gmra.mrb[14].mxu1 %vm104_vm0, %v4660_v54  ;;  %v1260_v20 = vld [vmem:[#allocation2 + $0x110] sm:$0xff] }
  0x4e   :  { %501 = vmatprep.mubr.f32.mxu0 %v6381_v0  ;;  %3773 = vmatpush1.bf16.msra.mxu0 %v3772_v52  ;;  %v3784_v23 = vpack.c.bf16 %v1260_v20, %v1258_v19  ;;  %v3798_v52 = vpack.c.bf16 %v1763_v50, %v1761_v48  ;;  %v3822_v48 = vpack.c.bf16 %v1723_v47, %v1721_v46 }
  0x4f   :  { %3775 = vmatprep.subr.bf16.mxu0 %v3774_v53  ;;  %337 = vmatprep.mubr.f32.mxu1 %v6381_v0  ;;  %v1760_v53 = vld [vmem:[%s6375_s2 + $0x140] sm:$0xff] }
  0x50   :  { %v3800_v7 = vpack.c.bf16 %v1762_v6, %v1760_v53 }
  0x51   :  { %3291 = vmatmul.mubr.msk.f32.gmra.mrb[4].mxu0 %vm104_vm0, %v4566_v28  ;;  %3275 = vmatmul.mubr.msk.f32.gmra.mrb[16].mxu1 %vm104_vm0, %v4671_v55 }
  0x52   :  { %507 = vmatprep.mubr.f32.mxu0 %v6381_v0  ;;  %343 = vmatprep.mubr.f32.mxu1 %v6381_v0 }
  0x55   :  { %3292 = vmatmul.mubr.msk.f32.gmra.mrb[6].mxu0 %vm104_vm0, %v4582_v32  ;;  %3276 = vmatmul.mubr.msk.f32.gmra.mrb[18].mxu1 %vm104_vm0, %v4682_v56 }
  0x56   :  { %513 = vmatprep.mubr.f32.mxu0 %v6381_v0  ;;  %349 = vmatprep.mubr.f32.mxu1 %v6381_v0 }
  0x59   :  { %3293 = vmatmul.mubr.msk.f32.gmra.mrb[8].mxu0 %vm104_vm0, %v4598_v34  ;;  %3277 = vmatmul.mubr.msk.f32.gmra.mrb[20].mxu1 %vm104_vm0, %v4693_v57 }
  0x5a   :  { %519 = vmatprep.mubr.f32.mxu0 %v6381_v0  ;;  %355 = vmatprep.mubr.f32.mxu1 %v6381_v0 }
  0x5d   :  { %3294 = vmatmul.mubr.msk.f32.gmra.mrb[10].mxu0 %vm104_vm0, %v4614_v36  ;;  %3278 = vmatmul.mubr.msk.f32.gmra.mrb[22].mxu1 %vm104_vm0, %v4704_v58 }
  0x5e   :  { %525 = vmatprep.mubr.f32.mxu0 %v6381_v0  ;;  %361 = vmatprep.mubr.f32.mxu1 %v6381_v0 }
  0x61   :  { %3295 = vmatmul.mubr.msk.f32.gmra.mrb[12].mxu0 %vm104_vm0, %v4630_v38  ;;  %3279 = vmatmul.mubr.msk.f32.gmra.mrb[24].mxu1 %vm104_vm0, %v4715_v59 }
  0x62   :  { %531 = vmatprep.mubr.f32.mxu0 %v6381_v0  ;;  %367 = vmatprep.mubr.f32.mxu1 %v6381_v0 }
  0x65   :  { %3296 = vmatmul.mubr.msk.f32.gmra.mrb[14].mxu0 %vm104_vm0, %v4556_v27  ;;  %3280 = vmatmul.mubr.msk.f32.gmra.mrb[26].mxu1 %vm104_vm0, %v4726_v60 }
  0x66   :  { %537 = vmatprep.mubr.f32.mxu0 %v6381_v0  ;;  %373 = vmatprep.mubr.f32.mxu1 %v6381_v0 }
  0x69   :  { %3297 = vmatmul.mubr.msk.f32.gmra.mrb[16].mxu0 %vm104_vm0, %v4572_v31  ;;  %3281 = vmatmul.mubr.msk.f32.gmra.mrb[28].mxu1 %vm104_vm0, %v4737_v61 }
  0x6a   :  { %543 = vmatprep.mubr.f32.mxu0 %v6381_v0  ;;  %379 = vmatprep.mubr.f32.mxu1 %v6381_v0 }
  0x6d   :  { %3298 = vmatmul.mubr.msk.f32.gmra.mrb[18].mxu0 %vm104_vm0, %v4588_v33  ;;  %3282 = vmatmul.mubr.msk.f32.gmra.mrb[30].mxu1 %vm104_vm0, %v4748_v62 }
  0x6e   :  { %549 = vmatprep.mubr.f32.mxu0 %v6381_v0  ;;  %385 = vmatprep.mubr.f32.mxu1 %v6381_v0 }
  0x71   :  { %3299 = vmatmul.mubr.msk.f32.gmra.mrb[20].mxu0 %vm104_vm0, %v4604_v35  ;;  %3283 = vmatmul.mubr.msk.f32.gmra.mrb[32].mxu1 %vm104_vm0, %v4759_v63 }
  0x72   :  { %555 = vmatprep.mubr.f32.mxu0 %v6381_v0  ;;  %391 = vmatprep.mubr.f32.mxu1 %v6381_v0 }
  0x75   :  { %3300 = vmatmul.mubr.msk.f32.gmra.mrb[22].mxu0 %vm104_vm0, %v4620_v37  ;;  %3284 = vmatmul.mubr.msk.f32.gmra.mrb[34].mxu1 %vm104_vm0, %v4770_v1 }
  0x76   :  { %561 = vmatprep.mubr.f32.mxu0 %v6381_v0  ;;  %397 = vmatprep.mubr.f32.mxu1 %v6381_v0 }
  0x79   :  { %3301 = vmatmul.mubr.msk.f32.gmra.mrb[24].mxu0 %vm104_vm0, %v4636_v41  ;;  %3285 = vmatmul.mubr.msk.f32.gmra.mrb[36].mxu1 %vm104_vm0, %v4781_v2 }
  0x7a   :  { %567 = vmatprep.mubr.f32.mxu0 %v6381_v0  ;;  %403 = vmatprep.mubr.f32.mxu1 %v6381_v0 }
  0x7d   :  { %3302 = vmatmul.mubr.msk.f32.gmra.mrb[26].mxu0 %vm104_vm0, %v4650_v49  ;;  %3286 = vmatmul.mubr.msk.f32.gmra.mrb[38].mxu1 %vm104_vm0, %v4792_v3 }
  0x7e   :  { %573 = vmatprep.mubr.f32.mxu0 %v6381_v0  ;;  %409 = vmatprep.mubr.f32.mxu1 %v6381_v0 }
  0x81   :  { %3303 = vmatmul.mubr.msk.f32.gmra.mrb[28].mxu0 %vm104_vm0, %v4660_v54  ;;  %3287 = vmatmul.mubr.msk.f32.gmra.mrb[40].mxu1 %vm104_vm0, %v4803_v4 }
  0x82   :  { %579 = vmatprep.mubr.f32.mxu0 %v6381_v0  ;;  %415 = vmatprep.mubr.f32.mxu1 %v6381_v0 }
  0x85   :  { %3304 = vmatmul.mubr.msk.f32.gmra.mrb[30].mxu0 %vm104_vm0, %v4671_v55  ;;  %3288 = vmatmul.mubr.msk.f32.gmra.mrb[42].mxu1 %vm104_vm0, %v4835_v5 }
  0x86   :  { %585 = vmatprep.mubr.f32.mxu0 %v6381_v0  ;;  %1848 = vmatprep.mubr.f32.mxu1 %v6381_v0 }
  0x89   :  { %3305 = vmatmul.mubr.msk.f32.gmra.mrb[32].mxu0 %vm104_vm0, %v4682_v56 }
  0x8a   :  { %591 = vmatprep.mubr.f32.mxu0 %v6381_v0 }
  0x8d   :  { %3306 = vmatmul.mubr.msk.f32.gmra.mrb[34].mxu0 %vm104_vm0, %v4693_v57 }
  0x8e   :  { %597 = vmatprep.mubr.f32.mxu0 %v6381_v0 }
  0x91   :  { %3307 = vmatmul.mubr.msk.f32.gmra.mrb[36].mxu0 %vm104_vm0, %v4704_v58 }
  0x92   :  { %603 = vmatprep.mubr.f32.mxu0 %v6381_v0 }
  0x95   :  { %3308 = vmatmul.mubr.msk.f32.gmra.mrb[38].mxu0 %vm104_vm0, %v4715_v59 }
  0x96   :  { %609 = vmatprep.mubr.f32.mxu0 %v6381_v0 }
  0x99   :  { %3309 = vmatmul.mubr.msk.f32.gmra.mrb[40].mxu0 %vm104_vm0, %v4726_v60 }
  0x9a   :  { %615 = vmatprep.mubr.f32.mxu0 %v6381_v0 }
  0x9d   :  { %3310 = vmatmul.mubr.msk.f32.gmra.mrb[42].mxu0 %vm104_vm0, %v4737_v61 }
  0x9e   :  { %621 = vmatprep.mubr.f32.mxu0 %v6381_v0 }
  0xa1   :  { %3311 = vmatmul.mubr.msk.f32.gmra.mrb[44].mxu0 %vm104_vm0, %v4748_v62 }
  0xa2   :  { %627 = vmatprep.mubr.f32.mxu0 %v6381_v0 }
  0xa5   :  { %3312 = vmatmul.mubr.msk.f32.gmra.mrb[46].mxu0 %vm104_vm0, %v4759_v63 }
  0xa6   :  { %633 = vmatprep.mubr.f32.mxu0 %v6381_v0 }
  0xa9   :  { %3313 = vmatmul.mubr.msk.f32.gmra.mrb[48].mxu0 %vm104_vm0, %v4770_v1 }
  0xaa   :  { %639 = vmatprep.mubr.f32.mxu0 %v6381_v0 }
  0xad   :  { %3314 = vmatmul.mubr.msk.f32.gmra.mrb[50].mxu0 %vm104_vm0, %v4781_v2 }
  0xae   :  { %645 = vmatprep.mubr.f32.mxu0 %v6381_v0 }
  0xb1   :  { %3315 = vmatmul.mubr.msk.f32.gmra.mrb[52].mxu0 %vm104_vm0, %v4792_v3 }
  0xb2   :  { %651 = vmatprep.mubr.f32.mxu0 %v6381_v0 }
  0xb5   :  { %3316 = vmatmul.mubr.msk.f32.gmra.mrb[54].mxu0 %vm104_vm0, %v4803_v4 }
  0xb6   :  { %733 = vmatprep.mubr.f32.mxu0 %v6381_v0 }
  0xb9   :  { %3317 = vmatmul.mubr.msk.f32.vlgmr.msra.gmra.mrb[0].mxu0 %vm104_vm0, %v4566_v28  ;;  %v3788_v28 = vpack.c.bf16 %v1264_v26, %v1262_v25 }
  0xba   :  { %3777 = vmatpush1.bf16.msra.mxu0 %v3776_v10  ;;  %739 = vmatprep.mubr.f32.mxu0 %v6381_v0  ;;  %v1783_v10 = vld [vmem:[%s6375_s2 + $0x1f8] sm:$0xff] }
  0xbb   :  { %3779 = vmatprep.subr.bf16.mxu0 %v3778_v11  ;;  %v3818_v11 = vpack.c.bf16 %v1783_v10, %v1781_v9 }
  0xbd   :  { %3318 = vmatmul.mubr.msk.f32.gmra.mrb[2].mxu0 %vm104_vm0, %v4582_v32 }
  0xbe   :  { %745 = vmatprep.mubr.f32.mxu0 %v6381_v0  ;;  %3781 = vmatpush1.bf16.msra.mxu0 %v3780_v16 }
  0xbf   :  { %3783 = vmatprep.subr.bf16.mxu0 %v3782_v17 }
  0xc1   :  { %3319 = vmatmul.mubr.msk.f32.gmra.mrb[4].mxu0 %vm104_vm0, %v4598_v34 }
  0xc2   :  { %751 = vmatprep.mubr.f32.mxu0 %v6381_v0 }
  0xc5   :  { %3320 = vmatmul.mubr.msk.f32.gmra.mrb[6].mxu0 %vm104_vm0, %v4614_v36 }
  0xc6   :  { %757 = vmatprep.mubr.f32.mxu0 %v6381_v0 }
  0xc9   :  { %3321 = vmatmul.mubr.msk.f32.gmra.mrb[8].mxu0 %vm104_vm0, %v4630_v38 }
  0xca   :  { %763 = vmatprep.mubr.f32.mxu0 %v6381_v0 }
  0xcd   :  { %3322 = vmatmul.mubr.msk.f32.gmra.mrb[10].mxu0 %vm104_vm0, %v4556_v27 }
  0xce   :  { %769 = vmatprep.mubr.f32.mxu0 %v6381_v0 }
  0xd1   :  { %3323 = vmatmul.mubr.msk.f32.gmra.mrb[12].mxu0 %vm104_vm0, %v4572_v31 }
  0xd2   :  { %775 = vmatprep.mubr.f32.mxu0 %v6381_v0 }
  0xd5   :  { %3324 = vmatmul.mubr.msk.f32.gmra.mrb[14].mxu0 %vm104_vm0, %v4588_v33 }
  0xd6   :  { %781 = vmatprep.mubr.f32.mxu0 %v6381_v0 }
  0xd9   :  { %3325 = vmatmul.mubr.msk.f32.gmra.mrb[16].mxu0 %vm104_vm0, %v4604_v35 }
  0xda   :  { %787 = vmatprep.mubr.f32.mxu0 %v6381_v0 }
  0xdd   :  { %3326 = vmatmul.mubr.msk.f32.gmra.mrb[18].mxu0 %vm104_vm0, %v4620_v37 }
  0xde   :  { %793 = vmatprep.mubr.f32.mxu0 %v6381_v0 }
  0xe1   :  { %3327 = vmatmul.mubr.msk.f32.gmra.mrb[20].mxu0 %vm104_vm0, %v4636_v41 }
  0xe2   :  { %799 = vmatprep.mubr.f32.mxu0 %v6381_v0 }
  0xe5   :  { %3328 = vmatmul.mubr.msk.f32.gmra.mrb[22].mxu0 %vm104_vm0, %v4650_v49 }
  0xe6   :  { %805 = vmatprep.mubr.f32.mxu0 %v6381_v0 }
  0xe9   :  { %3329 = vmatmul.mubr.msk.f32.gmra.mrb[24].mxu0 %vm104_vm0, %v4660_v54 }
  0xea   :  { %811 = vmatprep.mubr.f32.mxu0 %v6381_v0 }
  0xed   :  { %3330 = vmatmul.mubr.msk.f32.gmra.mrb[26].mxu0 %vm104_vm0, %v4671_v55 }
  0xee   :  { %817 = vmatprep.mubr.f32.mxu0 %v6381_v0 }
  0xf1   :  { %3331 = vmatmul.mubr.msk.f32.gmra.mrb[28].mxu0 %vm104_vm0, %v4682_v56 }
  0xf2   :  { %823 = vmatprep.mubr.f32.mxu0 %v6381_v0 }
  0xf5   :  { %3332 = vmatmul.mubr.msk.f32.gmra.mrb[30].mxu0 %vm104_vm0, %v4693_v57 }
  0xf6   :  { %829 = vmatprep.mubr.f32.mxu0 %v6381_v0 }
  0xf9   :  { %3333 = vmatmul.mubr.msk.f32.gmra.mrb[32].mxu0 %vm104_vm0, %v4704_v58 }
  0xfa   :  { %835 = vmatprep.mubr.f32.mxu0 %v6381_v0 }
  0xfd   :  { %3334 = vmatmul.mubr.msk.f32.gmra.mrb[34].mxu0 %vm104_vm0, %v4715_v59 }
  0xfe   :  { %841 = vmatprep.mubr.f32.mxu0 %v6381_v0 }
 0x101   :  { %3335 = vmatmul.mubr.msk.f32.gmra.mrb[36].mxu0 %vm104_vm0, %v4726_v60 }
 0x102   :  { %847 = vmatprep.mubr.f32.mxu0 %v6381_v0 }
 0x104   :  { %v5216_v15 = vpop.f32.mrb[0].mxu1 }
 0x105   :  { %3336 = vmatmul.mubr.msk.f32.gmra.mrb[38].mxu0 %vm104_vm0, %v4737_v61  ;;  %v5218_v16 = vpop.f32.mrb[1].mxu1 }
 0x106   :  { %853 = vmatprep.mubr.f32.mxu0 %v6381_v0 }
 0x108   :  { %v5221_v17 = vpop.f32.mrb[2].mxu1 }
 0x109   :  { %3337 = vmatmul.mubr.msk.f32.gmra.mrb[40].mxu0 %vm104_vm0, %v4748_v62 }
 0x10a   :  { %859 = vmatprep.mubr.f32.mxu0 %v6381_v0 }
 0x10d   :  { %3338 = vmatmul.mubr.msk.f32.gmra.mrb[42].mxu0 %vm104_vm0, %v4759_v63 }
 0x10e   :  { %865 = vmatprep.mubr.f32.mxu0 %v6381_v0 }
 0x111   :  { %3339 = vmatmul.mubr.msk.f32.gmra.mrb[44].mxu0 %vm104_vm0, %v4770_v1 }
 0x112   :  { %871 = vmatprep.mubr.f32.mxu0 %v6381_v0 }
 0x115   :  { %3340 = vmatmul.mubr.msk.f32.gmra.mrb[46].mxu0 %vm104_vm0, %v4781_v2 }
 0x116   :  { %877 = vmatprep.mubr.f32.mxu0 %v6381_v0 }
 0x119   :  { %3341 = vmatmul.mubr.msk.f32.gmra.mrb[48].mxu0 %vm104_vm0, %v4792_v3 }
 0x11a   :  { %883 = vmatprep.mubr.f32.mxu0 %v6381_v0 }
 0x11d   :  { %3342 = vmatmul.mubr.msk.f32.gmra.mrb[50].mxu0 %vm104_vm0, %v4803_v4 }
 0x11e   :  { %889 = vmatprep.mubr.f32.mxu0 %v6381_v0 }
 0x121   :  { %3343 = vmatmul.mubr.msk.f32.gmra.mrb[52].mxu0 %vm104_vm0, %v4835_v5 }
 0x122   :  { %895 = vmatprep.mubr.f32.mxu0 %v6381_v0 }
 0x125   :  { %3344 = vmatmul.mubr.msk.f32.gmra.mrb[54].mxu0 %vm104_vm0, %v4942_v18 }
 0x126   :  { %1033 = vmatprep.mubr.f32.mxu0 %v6381_v0 }
 0x129   :  { %3345 = vmatmul.mubr.msk.f32.vlgmr.msra.gmra.mrb[0].mxu0 %vm104_vm0, %v4582_v32  ;;  %v1752_v32 = vld [vmem:[%s6375_s2 + $0x100] sm:$0xff] }
 0x12a   :  { %3785 = vmatpush1.bf16.msra.mxu0 %v3784_v23  ;;  %1039 = vmatprep.mubr.f32.mxu0 %v6381_v0  ;;  %v3792_v44 = vpack.c.bf16 %v1754_v40, %v1752_v32 }
 0x12b   :  { %3787 = vmatprep.subr.bf16.mxu0 %v3786_v24 }
 0x12c   :  { %3793 = vmatpush1.bf16.msra.mxu1 %v3792_v44 }
 0x12d   :  { %3346 = vmatmul.mubr.msk.f32.gmra.mrb[2].mxu0 %vm104_vm0, %v4598_v34  ;;  %3795 = vmatprep.subr.bf16.mxu1 %v3794_v45 }
 0x12e   :  { %1045 = vmatprep.mubr.f32.mxu0 %v6381_v0  ;;  %3789 = vmatpush1.bf16.msra.mxu0 %v3788_v28 }
 0x130   :  { %3797 = vmatpush1.bf16.msra.mxu1 %v3796_v51 }
 0x131   :  { %3347 = vmatmul.mubr.msk.f32.gmra.mrb[4].mxu0 %vm104_vm0, %v4614_v36  ;;  %3799 = vmatprep.subr.bf16.mxu1 %v3798_v52 }
 0x132   :  { %1051 = vmatprep.mubr.f32.mxu0 %v6381_v0 }
 0x134   :  { %3801 = vmatpush1.bf16.msra.mxu1 %v3800_v7 }
 0x135   :  { %3348 = vmatmul.mubr.msk.f32.gmra.mrb[6].mxu0 %vm104_vm0, %v4630_v38 }
 0x136   :  { %1057 = vmatprep.mubr.f32.mxu0 %v6381_v0 }
 0x139   :  { %3349 = vmatmul.mubr.msk.f32.gmra.mrb[8].mxu0 %vm104_vm0, %v4556_v27 }
 0x13a   :  { %1063 = vmatprep.mubr.f32.mxu0 %v6381_v0 }
 0x13d   :  { %3350 = vmatmul.mubr.msk.f32.gmra.mrb[10].mxu0 %vm104_vm0, %v4572_v31 }
 0x13e   :  { %1069 = vmatprep.mubr.f32.mxu0 %v6381_v0 }
 0x141   :  { %3351 = vmatmul.mubr.msk.f32.gmra.mrb[12].mxu0 %vm104_vm0, %v4588_v33 }
 0x142   :  { %1075 = vmatprep.mubr.f32.mxu0 %v6381_v0 }
 0x145   :  { %3352 = vmatmul.mubr.msk.f32.gmra.mrb[14].mxu0 %vm104_vm0, %v4604_v35 }
 0x146   :  { %1081 = vmatprep.mubr.f32.mxu0 %v6381_v0 }
 0x149   :  { %3353 = vmatmul.mubr.msk.f32.gmra.mrb[16].mxu0 %vm104_vm0, %v4620_v37 }
 0x14a   :  { %1087 = vmatprep.mubr.f32.mxu0 %v6381_v0 }
 0x14d   :  { %3354 = vmatmul.mubr.msk.f32.gmra.mrb[18].mxu0 %vm104_vm0, %v4636_v41 }
 0x14e   :  { %1093 = vmatprep.mubr.f32.mxu0 %v6381_v0 }
 0x151   :  { %3355 = vmatmul.mubr.msk.f32.gmra.mrb[20].mxu0 %vm104_vm0, %v4650_v49 }
 0x152   :  { %1099 = vmatprep.mubr.f32.mxu0 %v6381_v0 }
 0x155   :  { %3356 = vmatmul.mubr.msk.f32.gmra.mrb[22].mxu0 %vm104_vm0, %v4660_v54 }
 0x156   :  { %1105 = vmatprep.mubr.f32.mxu0 %v6381_v0 }
 0x159   :  { %3357 = vmatmul.mubr.msk.f32.gmra.mrb[24].mxu0 %vm104_vm0, %v4671_v55 }
 0x15a   :  { %1111 = vmatprep.mubr.f32.mxu0 %v6381_v0 }
 0x15d   :  { %3358 = vmatmul.mubr.msk.f32.gmra.mrb[26].mxu0 %vm104_vm0, %v4682_v56 }
 0x15e   :  { %1117 = vmatprep.mubr.f32.mxu0 %v6381_v0 }
 0x161   :  { %3359 = vmatmul.mubr.msk.f32.gmra.mrb[28].mxu0 %vm104_vm0, %v4693_v57 }
 0x162   :  { %1123 = vmatprep.mubr.f32.mxu0 %v6381_v0 }
 0x165   :  { %3360 = vmatmul.mubr.msk.f32.gmra.mrb[30].mxu0 %vm104_vm0, %v4704_v58 }
 0x166   :  { %1129 = vmatprep.mubr.f32.mxu0 %v6381_v0 }
 0x169   :  { %3361 = vmatmul.mubr.msk.f32.gmra.mrb[32].mxu0 %vm104_vm0, %v4715_v59 }
 0x16a   :  { %1135 = vmatprep.mubr.f32.mxu0 %v6381_v0 }
 0x16d   :  { %3362 = vmatmul.mubr.msk.f32.gmra.mrb[34].mxu0 %vm104_vm0, %v4726_v60 }
 0x16e   :  { %1141 = vmatprep.mubr.f32.mxu0 %v6381_v0 }
 0x171   :  { %3363 = vmatmul.mubr.msk.f32.gmra.mrb[36].mxu0 %vm104_vm0, %v4737_v61 }
 0x172   :  { %1147 = vmatprep.mubr.f32.mxu0 %v6381_v0 }
 0x175   :  { %3364 = vmatmul.mubr.msk.f32.gmra.mrb[38].mxu0 %vm104_vm0, %v4748_v62 }
 0x176   :  { %1153 = vmatprep.mubr.f32.mxu0 %v6381_v0 }
 0x179   :  { %3365 = vmatmul.mubr.msk.f32.gmra.mrb[40].mxu0 %vm104_vm0, %v4759_v63 }
 0x17a   :  { %1159 = vmatprep.mubr.f32.mxu0 %v6381_v0 }
 0x17d   :  { %3366 = vmatmul.mubr.msk.f32.gmra.mrb[42].mxu0 %vm104_vm0, %v4770_v1 }
 0x17e   :  { %1165 = vmatprep.mubr.f32.mxu0 %v6381_v0 }
 0x181   :  { %3367 = vmatmul.mubr.msk.f32.gmra.mrb[44].mxu0 %vm104_vm0, %v4781_v2 }
 0x182   :  { %1171 = vmatprep.mubr.f32.mxu0 %v6381_v0 }
 0x185   :  { %3368 = vmatmul.mubr.msk.f32.gmra.mrb[46].mxu0 %vm104_vm0, %v4792_v3 }
 0x186   :  { %1177 = vmatprep.mubr.f32.mxu0 %v6381_v0 }
 0x189   :  { %3369 = vmatmul.mubr.msk.f32.gmra.mrb[48].mxu0 %vm104_vm0, %v4803_v4 }
 0x18a   :  { %1183 = vmatprep.mubr.f32.mxu0 %v6381_v0 }
 0x18d   :  { %3370 = vmatmul.mubr.msk.f32.gmra.mrb[50].mxu0 %vm104_vm0, %v4835_v5 }
 0x18e   :  { %1189 = vmatprep.mubr.f32.mxu0 %v6381_v0 }
 0x191   :  { %3371 = vmatmul.mubr.msk.f32.gmra.mrb[52].mxu0 %vm104_vm0, %v4942_v18 }
 0x192   :  { %1195 = vmatprep.mubr.f32.mxu0 %v6381_v0 }
 0x195   :  { %3372 = vmatmul.mubr.msk.f32.gmra.mrb[54].mxu0 %vm104_vm0, %v5067_v8 }
 0x196   :  { %1333 = vmatprep.mubr.f32.mxu0 %v6381_v0 }
 0x199   :  { %3373 = vmatmul.mubr.msk.f32.vlgmr.msra.gmra.mrb[0].mxu0 %vm104_vm0, %v4598_v34  ;;  %v1764_v34 = vld [vmem:[%s6375_s2 + $0x160] sm:$0xff] }
 0x19a   :  { %1339 = vmatprep.mubr.f32.mxu0 %v6381_v0 }
 0x19d   :  { %3374 = vmatmul.mubr.msk.f32.gmra.mrb[2].mxu0 %vm104_vm0, %v4614_v36 }
 0x19e   :  { %1345 = vmatprep.mubr.f32.mxu0 %v6381_v0 }
 0x1a1   :  { %3375 = vmatmul.mubr.msk.f32.gmra.mrb[4].mxu0 %vm104_vm0, %v4630_v38  ;;  %v1771_v38 = vld [vmem:[%s6375_s2 + $0x198] sm:$0xff] }
 0x1a2   :  { %1351 = vmatprep.mubr.f32.mxu0 %v6381_v0 }
 0x1a5   :  { %3376 = vmatmul.mubr.msk.f32.gmra.mrb[6].mxu0 %vm104_vm0, %v4556_v27  ;;  %v1765_v27 = vld [vmem:[%s6375_s2 + $0x168] sm:$0xff] }
 0x1a6   :  { %1357 = vmatprep.mubr.f32.mxu0 %v6381_v0 }
 0x1a9   :  { %3377 = vmatmul.mubr.msk.f32.gmra.mrb[8].mxu0 %vm104_vm0, %v4572_v31  ;;  %v1767_v31 = vld [vmem:[%s6375_s2 + $0x178] sm:$0xff] }
 0x1aa   :  { %1363 = vmatprep.mubr.f32.mxu0 %v6381_v0 }
 0x1ad   :  { %3378 = vmatmul.mubr.msk.f32.gmra.mrb[10].mxu0 %vm104_vm0, %v4588_v33  ;;  %v3802_v33 = vpack.c.bf16 %v1767_v31, %v1765_v27 }
 0x1ae   :  { %1369 = vmatprep.mubr.f32.mxu0 %v6381_v0 }
 0x1af   :  { %3803 = vmatprep.subr.bf16.mxu1 %v3802_v33 }
 0x1b1   :  { %3379 = vmatmul.mubr.msk.f32.gmra.mrb[12].mxu0 %vm104_vm0, %v4604_v35  ;;  %v1766_v35 = vld [vmem:[%s6375_s2 + $0x170] sm:$0xff] }
 0x1b2   :  { %1375 = vmatprep.mubr.f32.mxu0 %v6381_v0  ;;  %v3804_v36 = vpack.c.bf16 %v1766_v35, %v1764_v34 }
 0x1b4   :  { %3805 = vmatpush1.bf16.msra.mxu1 %v3804_v36 }
 0x1b5   :  { %3380 = vmatmul.mubr.msk.f32.gmra.mrb[14].mxu0 %vm104_vm0, %v4620_v37  ;;  %v1769_v37 = vld [vmem:[%s6375_s2 + $0x188] sm:$0xff] }
 0x1b6   :  { %1381 = vmatprep.mubr.f32.mxu0 %v6381_v0 }
 0x1b9   :  { %3381 = vmatmul.mubr.msk.f32.gmra.mrb[16].mxu0 %vm104_vm0, %v4636_v41  ;;  %v3806_v41 = vpack.c.bf16 %v1771_v38, %v1769_v37 }
 0x1ba   :  { %1387 = vmatprep.mubr.f32.mxu0 %v6381_v0 }
 0x1bb   :  { %3807 = vmatprep.subr.bf16.mxu1 %v3806_v41 }
 0x1bd   :  { %3382 = vmatmul.mubr.msk.f32.gmra.mrb[18].mxu0 %vm104_vm0, %v4650_v49  ;;  %v1768_v49 = vld [vmem:[%s6375_s2 + $0x180] sm:$0xff] }
 0x1be   :  { %1393 = vmatprep.mubr.f32.mxu0 %v6381_v0 }
 0x1c1   :  { %3383 = vmatmul.mubr.msk.f32.gmra.mrb[20].mxu0 %vm104_vm0, %v4660_v54  ;;  %v1770_v54 = vld [vmem:[%s6375_s2 + $0x190] sm:$0xff] }
 0x1c2   :  { %1399 = vmatprep.mubr.f32.mxu0 %v6381_v0 }
 0x1c5   :  { %3384 = vmatmul.mubr.msk.f32.gmra.mrb[22].mxu0 %vm104_vm0, %v4671_v55  ;;  %v3808_v55 = vpack.c.bf16 %v1770_v54, %v1768_v49 }
 0x1c6   :  { %1405 = vmatprep.mubr.f32.mxu0 %v6381_v0 }
 0x1c7   :  { %3809 = vmatpush1.bf16.msra.mxu1 %v3808_v55 }
 0x1c9   :  { %3385 = vmatmul.mubr.msk.f32.gmra.mrb[24].mxu0 %vm104_vm0, %v4682_v56  ;;  %v1773_v56 = vld [vmem:[%s6375_s2 + $0x1a8] sm:$0xff] }
 0x1ca   :  { %1411 = vmatprep.mubr.f32.mxu0 %v6381_v0 }
 0x1cd   :  { %3386 = vmatmul.mubr.msk.f32.gmra.mrb[26].mxu0 %vm104_vm0, %v4693_v57  ;;  %v1775_v57 = vld [vmem:[%s6375_s2 + $0x1b8] sm:$0xff] }
 0x1ce   :  { %1417 = vmatprep.mubr.f32.mxu0 %v6381_v0 }
 0x1d1   :  { %3387 = vmatmul.mubr.msk.f32.gmra.mrb[28].mxu0 %vm104_vm0, %v4704_v58  ;;  %v3810_v58 = vpack.c.bf16 %v1775_v57, %v1773_v56 }
 0x1d2   :  { %1423 = vmatprep.mubr.f32.mxu0 %v6381_v0 }
 0x1d3   :  { %3811 = vmatprep.subr.bf16.mxu1 %v3810_v58 }
 0x1d5   :  { %3388 = vmatmul.mubr.msk.f32.gmra.mrb[30].mxu0 %vm104_vm0, %v4715_v59  ;;  %v1772_v59 = vld [vmem:[%s6375_s2 + $0x1a0] sm:$0xff] }
 0x1d6   :  { %1429 = vmatprep.mubr.f32.mxu0 %v6381_v0 }
 0x1d9   :  { %3389 = vmatmul.mubr.msk.f32.gmra.mrb[32].mxu0 %vm104_vm0, %v4726_v60  ;;  %v1774_v60 = vld [vmem:[%s6375_s2 + $0x1b0] sm:$0xff] }
 0x1da   :  { %1435 = vmatprep.mubr.f32.mxu0 %v6381_v0 }
 0x1dd   :  { %3390 = vmatmul.mubr.msk.f32.gmra.mrb[34].mxu0 %vm104_vm0, %v4737_v61  ;;  %v3812_v61 = vpack.c.bf16 %v1774_v60, %v1772_v59  ;;  %v1558_v59 = vlaneseq }
 0x1de   :  { %1441 = vmatprep.mubr.f32.mxu0 %v6381_v0 }
 0x1df   :  { %3813 = vmatpush1.bf16.msra.mxu1 %v3812_v61  ;;  %v5311_v60 = vshrl.u32 %v1558_v59, 7 }
 0x1e1   :  { %3391 = vmatmul.mubr.msk.f32.gmra.mrb[36].mxu0 %vm104_vm0, %v4748_v62  ;;  %v1777_v62 = vld [vmem:[%s6375_s2 + $0x1c8] sm:$0xff]  ;;  %6390 = vst [vmem:[#allocation12_spill] sm:$0xff] %v5311_v60  ;;  %v1560_v61 = vsub.s32 0, %v5311_v60 }
 0x1e2   :  { %1447 = vmatprep.mubr.f32.mxu0 %v6381_v0 }
 0x1e5   :  { %3392 = vmatmul.mubr.msk.f32.gmra.mrb[38].mxu0 %vm104_vm0, %v4759_v63  ;;  %v1779_v63 = vld [vmem:[%s6375_s2 + $0x1d8] sm:$0xff] }
 0x1e6   :  { %1453 = vmatprep.mubr.f32.mxu0 %v6381_v0 }
 0x1e9   :  { %3393 = vmatmul.mubr.msk.f32.gmra.mrb[40].mxu0 %vm104_vm0, %v4770_v1  ;;  %v3814_v1 = vpack.c.bf16 %v1779_v63, %v1777_v62  ;;  %v54_v62 = vld [vmem:[%s6379_s6] sm:$0xff]  ;;  %v55_v63 = vld [vmem:[%s6379_s6 + $0x8] sm:$0xff] }
 0x1ea   :  { %1459 = vmatprep.mubr.f32.mxu0 %v6381_v0 }
 0x1eb   :  { %3815 = vmatprep.subr.bf16.mxu1 %v3814_v1  ;;  %v5320_v1 = vrot.slane %v54_v62, %v1560_v61 }
 0x1ed   :  { %3394 = vmatmul.mubr.msk.f32.gmra.mrb[42].mxu0 %vm104_vm0, %v4781_v2  ;;  %v1776_v2 = vld [vmem:[%s6375_s2 + $0x1c0] sm:$0xff] }
 0x1ee   :  { %1465 = vmatprep.mubr.f32.mxu0 %v6381_v0 }
 0x1f1   :  { %3395 = vmatmul.mubr.msk.f32.gmra.mrb[44].mxu0 %vm104_vm0, %v4792_v3  ;;  %v1778_v3 = vld [vmem:[%s6375_s2 + $0x1d0] sm:$0xff] }
 0x1f2   :  { %1471 = vmatprep.mubr.f32.mxu0 %v6381_v0 }
 0x1f5   :  { %3396 = vmatmul.mubr.msk.f32.gmra.mrb[46].mxu0 %vm104_vm0, %v4803_v4  ;;  %v3816_v4 = vpack.c.bf16 %v1778_v3, %v1776_v2  ;;  %v5322_v2 = vrot.slane %v55_v63, %v1560_v61 }
 0x1f6   :  { %1477 = vmatprep.mubr.f32.mxu0 %v6381_v0 }
 0x1f7   :  { %3817 = vmatpush1.bf16.msra.mxu1 %v3816_v4 }
 0x1f8   :  { %3819 = vmatprep.subr.bf16.mxu1 %v3818_v11 }
 0x1f9   :  { %3397 = vmatmul.mubr.msk.f32.gmra.mrb[48].mxu0 %vm104_vm0, %v4835_v5  ;;  %v1782_v5 = vld [vmem:[%s6375_s2 + $0x1f0] sm:$0xff] }
 0x1fa   :  { %1483 = vmatprep.mubr.f32.mxu0 %v6381_v0  ;;  %v3820_v13 = vpack.c.bf16 %v1782_v5, %v1780_v12 }
 0x1fc   :  { %3821 = vmatpush1.bf16.msra.mxu1 %v3820_v13 }
 0x1fd   :  { %3398 = vmatmul.mubr.msk.f32.gmra.mrb[50].mxu0 %vm104_vm0, %v4942_v18  ;;  %v5223_v18 = vpop.f32.mrb[3].mxu1  ;;  %3823 = vmatprep.subr.bf16.mxu1 %v3822_v48 }
 0x1fe   :  { %1489 = vmatprep.mubr.f32.mxu0 %v6381_v0  ;;  %v5225_v19 = vpop.f32.mrb[4].mxu1 }
 0x1ff   :  { %v5227_v20 = vpop.f32.mrb[5].mxu1 }
 0x200   :  { %v5229_v21 = vpop.f32.mrb[6].mxu1 }
 0x201   :  { %3399 = vmatmul.mubr.msk.f32.gmra.mrb[52].mxu0 %vm104_vm0, %v5067_v8  ;;  %v5231_v22 = vpop.f32.mrb[7].mxu1 }
 0x202   :  { %1495 = vmatprep.mubr.f32.mxu0 %v6381_v0  ;;  %v5233_v23 = vpop.f32.mrb[8].mxu1 }
 0x203   :  { %v5235_v24 = vpop.f32.mrb[9].mxu1 }
 0x204   :  { %v5237_v25 = vpop.f32.mrb[10].mxu1 }
 0x205   :  { %3400 = vmatmul.mubr.msk.f32.gmra.mrb[54].mxu0 %vm104_vm0, %v87_v14  ;;  %v5239_v26 = vpop.f32.mrb[11].mxu1 }
 0x206   :  { %v5241_v28 = vpop.f32.mrb[12].mxu1 }
 0x207   :  { %v5243_v29 = vpop.f32.mrb[13].mxu1 }
 0x208   :  { %v5245_v30 = vpop.f32.mrb[14].mxu1 }
 0x209   :  { %v5247_v32 = vpop.f32.mrb[15].mxu1 }
 0x20a   :  { %v5249_v39 = vpop.f32.mrb[16].mxu1 }
 0x20b   :  { %v5251_v40 = vpop.f32.mrb[17].mxu1 }
 0x20c   :  { %v5253_v42 = vpop.f32.mrb[18].mxu1 }
 0x20d   :  { %v5255_v43 = vpop.f32.mrb[19].mxu1 }
 0x20e   :  { %v5257_v44 = vpop.f32.mrb[20].mxu1 }
 0x20f   :  { %v5259_v45 = vpop.f32.mrb[21].mxu1 }
 0x210   :  { %v5267_v50 = vpop.f32.mrb[22].mxu1 }
 0x211   :  { %v5269_v51 = vpop.f32.mrb[23].mxu1 }
 0x212   :  { %v5271_v52 = vpop.f32.mrb[24].mxu1 }
 0x213   :  { %v5273_v53 = vpop.f32.mrb[25].mxu1 }
 0x214   :  { %v5275_v6 = vpop.f32.mrb[26].mxu1 }
 0x215   :  { %v5277_v7 = vpop.f32.mrb[27].mxu1 }
 0x216   :  { %v5279_v8 = vpop.f32.mrb[28].mxu1 }
 0x217   :  { %v5281_v27 = vpop.f32.mrb[29].mxu1 }
 0x218   :  { %v5283_v31 = vpop.f32.mrb[30].mxu1 }
 0x219   :  { %v5285_v33 = vpop.f32.mrb[31].mxu1 }
 0x21a   :  { %v5287_v34 = vpop.f32.mrb[32].mxu1 }
 0x21b   :  { %v5289_v35 = vpop.f32.mrb[33].mxu1 }
 0x21c   :  { %v5291_v36 = vpop.f32.mrb[34].mxu1 }
 0x21d   :  { %v5293_v37 = vpop.f32.mrb[35].mxu1 }
 0x21e   :  { %v5295_v38 = vpop.f32.mrb[36].mxu1 }
 0x21f   :  { %v5297_v41 = vpop.f32.mrb[37].mxu1 }
 0x220   :  { %v5299_v49 = vpop.f32.mrb[38].mxu1 }
 0x221   :  { %v5301_v54 = vpop.f32.mrb[39].mxu1 }
 0x222   :  { %v5303_v55 = vpop.f32.mrb[40].mxu1 }
 0x223   :  { %6386 = vst [vmem:[#allocation8_spill] sm:$0xff] %v5303_v55  ;;  %v5305_v56 = vpop.f32.mrb[41].mxu1 }
 0x224   :  { %6387 = vst [vmem:[#allocation9_spill] sm:$0xff] %v5305_v56  ;;  %v5307_v57 = vpop.f32.mrb[42].mxu1  ;;  %v1726_v56 = vld [vmem:[%s6375_s2 + $0x30] sm:$0xff] }
 0x225   :  { %6388 = vst [vmem:[#allocation10_spill] sm:$0xff] %v5307_v57  ;;  %v5309_v58 = vpop.f32.mrb[43].mxu1 }
 0x226   :  { %6389 = vst [vmem:[#allocation11_spill] sm:$0xff] %v5309_v58 }
 0x26c   :  { %v1335_v3 = vpop.f32.mrb[0].mxu0 }
 0x26d   :  { %v1566_v4 = vadd.f32 %v5320_v1, %v1335_v3  ;;  %v1337_v9 = vpop.f32.mrb[1].mxu0 }
 0x26e   :  { %v1567_v10 = vadd.f32 %v5322_v2, %v1337_v9 }
 0x26f   :  { %v1622_v11 = vmax.f32 %v1566_v4, 0.0 }
 0x270   :  { %v1623_v12 = vmax.f32 %v1567_v10, 0.0  ;;  %v1341_v5 = vpop.f32.mrb[2].mxu0 }
 0x271   :  { %v1568_v13 = vadd.f32 %v5320_v1, %v1341_v5  ;;  %v1343_v14 = vpop.f32.mrb[3].mxu0 }
 0x272   :  { %v5327_v46 = vmax.f32 %v1622_v11, %v1623_v12  ;;  %v1569_v47 = vadd.f32 %v5322_v2, %v1343_v14 }
 0x273   :  { %v1624_v48 = vmax.f32 %v1568_v13, 0.0 }
 0x274   :  { %v1625_v59 = vmax.f32 %v1569_v47, 0.0  ;;  %v1347_v61 = vpop.f32.mrb[4].mxu0 }
 0x275   :  { %v1570_v62 = vadd.f32 %v5320_v1, %v1347_v61  ;;  %v1349_v63 = vpop.f32.mrb[5].mxu0 }
 0x276   :  { %v5331_v3 = vmax.f32 %v1624_v48, %v1625_v59  ;;  %v1571_v9 = vadd.f32 %v5322_v2, %v1349_v63  ;;  %v1720_v48 = vld [vmem:[%s6375_s2] sm:$0xff]  ;;  %v1722_v59 = vld [vmem:[%s6375_s2 + $0x10] sm:$0xff] }
 0x277   :  { %v1626_v4 = vmax.f32 %v1570_v62, 0.0 }
 0x278   :  { %v1627_v5 = vmax.f32 %v1571_v9, 0.0  ;;  %v1353_v0 = vpop.f32.mrb[6].mxu0  ;;  %v1727_v9 = vld [vmem:[%s6375_s2 + $0x38] sm:$0xff] }
 0x279   :  { %v1572_v11 = vadd.f32 %v5320_v1, %v1353_v0  ;;  %v1355_v12 = vpop.f32.mrb[7].mxu0  ;;  %v1725_v0 = vld [vmem:[%s6375_s2 + $0x28] sm:$0xff] }
 0x27a   :  { %v1680_v14 = vmax.f32 %v1626_v4, %v1627_v5  ;;  %v1573_v13 = vadd.f32 %v5322_v2, %v1355_v12  ;;  %v3824_v12 = vpack.c.bf16 %v1722_v59, %v1720_v48  ;;  %v3826_v57 = vpack.c.bf16 %v1727_v9, %v1725_v0 }
 0x27b   :  { %v1628_v47 = vmax.f32 %v1572_v11, 0.0 }
 0x27c   :  { %v1629_v60 = vmax.f32 %v1573_v13, 0.0  ;;  %v1359_v61 = vpop.f32.mrb[8].mxu0 }
 0x27d   :  { %v1574_v62 = vadd.f32 %v5320_v1, %v1359_v61  ;;  %v1361_v63 = vpop.f32.mrb[9].mxu0  ;;  %v1724_v61 = vld [vmem:[%s6375_s2 + $0x20] sm:$0xff] }
 0x27e   :  { %v1681_v4 = vmax.f32 %v1628_v47, %v1629_v60  ;;  %v1575_v5 = vadd.f32 %v5322_v2, %v1361_v63  ;;  %v1729_v47 = vld [vmem:[%s6375_s2 + $0x48] sm:$0xff]  ;;  %v6392_v63 = vmov 0.0   ;;  %v3828_v0 = vpack.c.bf16 %v1726_v56, %v1724_v61  ;;  %v1735_v56 = vld [vmem:[%s6375_s2 + $0x78] sm:$0xff] }
 0x27f   :  { %v1630_v11 = vmax.f32 %v1574_v62, 0.0 }
 0x280   :  { %v5352_v13 = vmax.f32 %v1680_v14, %v1681_v4  ;;  %v1631_v10 = vmax.f32 %v1575_v5, 0.0  ;;  %v1365_v58 = vpop.f32.mrb[10].mxu0  ;;  %v1731_v14 = vld [vmem:[%s6375_s2 + $0x58] sm:$0xff]  ;;  %v1728_v5 = vld [vmem:[%s6375_s2 + $0x40] sm:$0xff] }
 0x281   :  { %v1576_v55 = vadd.f32 %v5320_v1, %v1365_v58  ;;  %v1367_v60 = vpop.f32.mrb[11].mxu0  ;;  %v3830_v4 = vpack.c.bf16 %v1731_v14, %v1729_v47 }
 0x282   :  { %6391 = vst [vmem:[#allocation13_spill] sm:$0xff] %v5352_v13  ;;  %v1682_v48 = vmax.f32 %v1630_v11, %v1631_v10  ;;  %v1577_v59 = vadd.f32 %v5322_v2, %v1367_v60  ;;  %1849 = vmatmul.mubr.f32.vlgmr.msra.gmra.mrb[44].mxu1 %v5352_v13  ;;  %v1730_v10 = vld [vmem:[%s6375_s2 + $0x50] sm:$0xff]  ;;  %v1732_v13 = vld [vmem:[%s6375_s2 + $0x60] sm:$0xff] }
 0x283   :  { %v1632_v62 = vmax.f32 %v1576_v55, 0.0  ;;  %1854 = vmatprep.mubr.f32.mxu1 %v6392_v63  ;;  %3825 = vmatpush1.bf16.msra.mxu1 %v3824_v12  ;;  %v1733_v55 = vld [vmem:[%s6375_s2 + $0x68] sm:$0xff]  ;;  %v3832_v47 = vpack.c.bf16 %v1730_v10, %v1728_v5 }
 0x284   :  { %v1633_v58 = vmax.f32 %v1577_v59, 0.0  ;;  %v1371_v9 = vpop.f32.mrb[12].mxu0  ;;  %3827 = vmatprep.subr.bf16.mxu1 %v3826_v57  ;;  %v1737_v5 = vld [vmem:[%s6375_s2 + $0x88] sm:$0xff] }
 0x285   :  { %v4110_v11 = vadd.f32 %v1371_v9, %v5216_v15  ;;  %v1373_v60 = vpop.f32.mrb[13].mxu0  ;;  %v3834_v9 = vpack.c.bf16 %v1735_v56, %v1733_v55 }
 0x286   :  { %v1683_v57 = vmax.f32 %v1632_v62, %v1633_v58  ;;  %v4111_v12 = vadd.f32 %v1373_v60, %v5218_v16  ;;  %v1734_v62 = vld [vmem:[%s6375_s2 + $0x70] sm:$0xff] }
 0x287   :  { %v1578_v61 = vadd.f32 %v4110_v11, %v5320_v1  ;;  %3829 = vmatpush1.bf16.msra.mxu1 %v3828_v0 }
 0x288   :  { %v1579_v14 = vadd.f32 %v4111_v12, %v5322_v2  ;;  %v1377_v59 = vpop.f32.mrb[14].mxu0  ;;  %v5386_v15 = vmax.f32 %v1682_v48, %v1683_v57  ;;  %3831 = vmatprep.subr.bf16.mxu1 %v3830_v4  ;;  %v1739_v48 = vld [vmem:[%s6375_s2 + $0x98] sm:$0xff]  ;;  %v1736_v12 = vld [vmem:[%s6375_s2 + $0x80] sm:$0xff] }
 0x289   :  { %v1634_v16 = vmax.f32 %v1578_v61, 0.0  ;;  %v4112_v58 = vadd.f32 %v1377_v59, %v5221_v17  ;;  %v1379_v0 = vpop.f32.mrb[15].mxu0  ;;  %v3836_v17 = vpack.c.bf16 %v1734_v62, %v1732_v13  ;;  %v3838_v57 = vpack.c.bf16 %v1739_v48, %v1737_v5  ;;  %v1741_v13 = vld [vmem:[%s6375_s2 + $0xa8] sm:$0xff] }
 0x28a   :  { %v1635_v4 = vmax.f32 %v1579_v14, 0.0  ;;  %v4113_v10 = vadd.f32 %v1379_v0, %v5223_v18  ;;  %1855 = vmatmul.mubr.f32.gmra.mrb[46].mxu1 %v5386_v15  ;;  %v1738_v18 = vld [vmem:[%s6375_s2 + $0x90] sm:$0xff] }
 0x28b   :  { %v1580_v11 = vadd.f32 %v4112_v58, %v5320_v1  ;;  %1860 = vmatprep.mubr.f32.mxu1 %v6392_v63  ;;  %3833 = vmatpush1.bf16.msra.mxu1 %v3832_v47  ;;  %v1743_v47 = vld [vmem:[%s6375_s2 + $0xb8] sm:$0xff]  ;;  %v3840_v58 = vpack.c.bf16 %v1738_v18, %v1736_v12 }
 0x28c   :  { %v1684_v60 = vmax.f32 %v1634_v16, %v1635_v4  ;;  %v1581_v55 = vadd.f32 %v4113_v10, %v5322_v2  ;;  %v1383_v56 = vpop.f32.mrb[16].mxu0  ;;  %3835 = vmatprep.subr.bf16.mxu1 %v3834_v9  ;;  %v3842_v48 = vpack.c.bf16 %v1743_v47, %v1741_v13  ;;  %v1740_v4 = vld [vmem:[%s6375_s2 + $0xa0] sm:$0xff]  ;;  %v1742_v10 = vld [vmem:[%s6375_s2 + $0xb0] sm:$0xff] }
 0x28d   :  { %v1636_v61 = vmax.f32 %v1580_v11, 0.0  ;;  %v4114_v14 = vadd.f32 %v1383_v56, %v5225_v19  ;;  %v1385_v59 = vpop.f32.mrb[17].mxu0  ;;  %v1747_v56 = vld [vmem:[%s6375_s2 + $0xd8] sm:$0xff] }
 0x28e   :  { %v1637_v9 = vmax.f32 %v1581_v55, 0.0  ;;  %v4115_v62 = vadd.f32 %v1385_v59, %v5227_v20 }
 0x28f   :  { %v1582_v16 = vadd.f32 %v4114_v14, %v5320_v1  ;;  %3837 = vmatpush1.bf16.msra.mxu1 %v3836_v17  ;;  %v1745_v17 = vld [vmem:[%s6375_s2 + $0xc8] sm:$0xff]  ;;  %v3844_v14 = vpack.c.bf16 %v1742_v10, %v1740_v4 }
 0x290   :  { %v1685_v0 = vmax.f32 %v1636_v61, %v1637_v9  ;;  %v1583_v5 = vadd.f32 %v4115_v62, %v5322_v2  ;;  %v1389_v19 = vpop.f32.mrb[18].mxu0  ;;  %3839 = vmatprep.subr.bf16.mxu1 %v3838_v57  ;;  %v3846_v47 = vpack.c.bf16 %v1747_v56, %v1745_v17  ;;  %v1750_v17 = vld [vmem:[%s6375_s2 + $0xf0] sm:$0xff] }
 0x291   :  { %v1638_v11 = vmax.f32 %v1582_v16, 0.0  ;;  %v4116_v20 = vadd.f32 %v1389_v19, %v5229_v21  ;;  %v1391_v55 = vpop.f32.mrb[19].mxu0 }
 0x292   :  { %v5435_v57 = vmax.f32 %v1684_v60, %v1685_v0  ;;  %v1639_v12 = vmax.f32 %v1583_v5, 0.0  ;;  %v4117_v18 = vadd.f32 %v1391_v55, %v5231_v22  ;;  %v1744_v60 = vld [vmem:[%s6375_s2 + $0xc0] sm:$0xff]  ;;  %v1746_v22 = vld [vmem:[%s6375_s2 + $0xd0] sm:$0xff]  ;;  %v1751_v0 = vld [vmem:[%s6375_s2 + $0xf8] sm:$0xff] }
 0x293   :  { %v1584_v61 = vadd.f32 %v4116_v20, %v5320_v1  ;;  %3841 = vmatpush1.bf16.msra.mxu1 %v3840_v58  ;;  %v1749_v58 = vld [vmem:[%s6375_s2 + $0xe8] sm:$0xff]  ;;  %v3848_v4 = vpack.c.bf16 %v1746_v22, %v1744_v60  ;;  %v1748_v55 = vld [vmem:[%s6375_s2 + $0xe0] sm:$0xff] }
 0x294   :  { %v1686_v59 = vmax.f32 %v1638_v11, %v1639_v12  ;;  %v1585_v21 = vadd.f32 %v4117_v18, %v5322_v2  ;;  %v1395_v13 = vpop.f32.mrb[20].mxu0  ;;  %1861 = vmatmul.mubr.f32.gmra.mrb[48].mxu1 %v5435_v57  ;;  %3843 = vmatprep.subr.bf16.mxu1 %v3842_v48  ;;  %v3850_v20 = vpack.c.bf16 %v1751_v0, %v1749_v58  ;;  %v2035_v18 = vld [vmem:[%s6375_s2 + $0x208] sm:$0xff] }
 0x295   :  { %v1640_v9 = vmax.f32 %v1584_v61, 0.0  ;;  %v4118_v62 = vadd.f32 %v1395_v13, %v5233_v23  ;;  %v1397_v16 = vpop.f32.mrb[21].mxu0  ;;  %1866 = vmatprep.mubr.f32.mxu1 %v6392_v63  ;;  %v2037_v61 = vld [vmem:[%s6375_s2 + $0x218] sm:$0xff]  ;;  %v3852_v60 = vpack.c.bf16 %v1750_v17, %v1748_v55 }
 0x296   :  { %v1641_v5 = vmax.f32 %v1585_v21, 0.0  ;;  %v4119_v19 = vadd.f32 %v1397_v16, %v5235_v24 }
 0x297   :  { %v1586_v48 = vadd.f32 %v4118_v62, %v5320_v1  ;;  %3845 = vmatpush1.bf16.msra.mxu1 %v3844_v14  ;;  %v3854_v62 = vpack.c.bf16 %v2037_v61, %v2035_v18 }
 0x298   :  { %v1687_v10 = vmax.f32 %v1640_v9, %v1641_v5  ;;  %v1587_v23 = vadd.f32 %v4119_v19, %v5322_v2  ;;  %v1401_v11 = vpop.f32.mrb[22].mxu0  ;;  %3847 = vmatprep.subr.bf16.mxu1 %v3846_v47 }
 0x299   :  { %v1642_v56 = vmax.f32 %v1586_v48, 0.0  ;;  %v4120_v24 = vadd.f32 %v1401_v11, %v5237_v25  ;;  %v1403_v12 = vpop.f32.mrb[23].mxu0 }
 0x29a   :  { %v5471_v14 = vmax.f32 %v1686_v59, %v1687_v10  ;;  %v1643_v21 = vmax.f32 %v1587_v23, 0.0  ;;  %v4121_v13 = vadd.f32 %v1403_v12, %v5239_v26 }
 0x29b   :  { %v1588_v47 = vadd.f32 %v4120_v24, %v5320_v1  ;;  %3849 = vmatpush1.bf16.msra.mxu1 %v3848_v4 }
 0x29c   :  { %v1688_v22 = vmax.f32 %v1642_v56, %v1643_v21  ;;  %v1589_v25 = vadd.f32 %v4121_v13, %v5322_v2  ;;  %v1407_v9 = vpop.f32.mrb[24].mxu0  ;;  %1867 = vmatmul.mubr.f32.gmra.mrb[50].mxu1 %v5471_v14  ;;  %3851 = vmatprep.subr.bf16.mxu1 %v3850_v20 }
 0x29d   :  { %v1644_v16 = vmax.f32 %v1588_v47, 0.0  ;;  %v4122_v58 = vadd.f32 %v1407_v9, %v5241_v28  ;;  %v1409_v59 = vpop.f32.mrb[25].mxu0  ;;  %1872 = vmatprep.mubr.f32.mxu1 %v6392_v63 }
 0x29e   :  { %v1645_v0 = vmax.f32 %v1589_v25, 0.0  ;;  %v4123_v26 = vadd.f32 %v1409_v59, %v5243_v29 }
 0x29f   :  { %v1590_v5 = vadd.f32 %v4122_v58, %v5320_v1  ;;  %3853 = vmatpush1.bf16.msra.mxu1 %v3852_v60 }
 0x2a0   :  { %v1689_v19 = vmax.f32 %v1644_v16, %v1645_v0  ;;  %v1591_v48 = vadd.f32 %v4123_v26, %v5322_v2  ;;  %v1413_v4 = vpop.f32.mrb[26].mxu0  ;;  %3855 = vmatprep.subr.bf16.mxu1 %v3854_v62 }
 0x2a1   :  { %v1646_v10 = vmax.f32 %v1590_v5, 0.0  ;;  %v4124_v23 = vadd.f32 %v1413_v4, %v5245_v30  ;;  %v1415_v11 = vpop.f32.mrb[27].mxu0 }
 0x2a2   :  { %v5483_v20 = vmax.f32 %v1688_v22, %v1689_v19  ;;  %v1647_v28 = vmax.f32 %v1591_v48, 0.0  ;;  %v4125_v55 = vadd.f32 %v1415_v11, %v5247_v32 }
 0x2a3   :  { %v1592_v17 = vadd.f32 %v4124_v23, %v5320_v1 }
 0x2a4   :  { %v1690_v29 = vmax.f32 %v1646_v10, %v1647_v28  ;;  %v1593_v56 = vadd.f32 %v4125_v55, %v5322_v2  ;;  %v1419_v24 = vpop.f32.mrb[28].mxu0  ;;  %1873 = vmatmul.mubr.f32.gmra.mrb[52].mxu1 %v5483_v20 }
 0x2a5   :  { %v1648_v12 = vmax.f32 %v1592_v17, 0.0  ;;  %v4126_v18 = vadd.f32 %v1419_v24, %v5249_v39  ;;  %v1421_v61 = vpop.f32.mrb[29].mxu0  ;;  %1878 = vmatprep.mubr.f32.mxu1 %v6392_v63 }
 0x2a6   :  { %v1649_v30 = vmax.f32 %v1593_v56, 0.0  ;;  %v4127_v21 = vadd.f32 %v1421_v61, %v5251_v40 }
 0x2a7   :  { %v1594_v13 = vadd.f32 %v4126_v18, %v5320_v1 }
 0x2a8   :  { %v1691_v32 = vmax.f32 %v1648_v12, %v1649_v30  ;;  %v1595_v47 = vadd.f32 %v4127_v21, %v5322_v2  ;;  %v1425_v60 = vpop.f32.mrb[30].mxu0 }
 0x2a9   :  { %v1650_v22 = vmax.f32 %v1594_v13, 0.0  ;;  %v4128_v25 = vadd.f32 %v1425_v60, %v5253_v42  ;;  %v1427_v9 = vpop.f32.mrb[31].mxu0 }
 0x2aa   :  { %v5495_v62 = vmax.f32 %v1690_v29, %v1691_v32  ;;  %v1651_v16 = vmax.f32 %v1595_v47, 0.0  ;;  %v4129_v39 = vadd.f32 %v1427_v9, %v5255_v43 }
 0x2ab   :  { %v1596_v58 = vadd.f32 %v4128_v25, %v5320_v1 }
 0x2ac   :  { %v1692_v59 = vmax.f32 %v1650_v22, %v1651_v16  ;;  %v1597_v40 = vadd.f32 %v4129_v39, %v5322_v2  ;;  %v1431_v0 = vpop.f32.mrb[32].mxu0  ;;  %1879 = vmatmul.mubr.f32.gmra.mrb[54].mxu1 %v5495_v62 }
 0x2ad   :  { %v1652_v26 = vmax.f32 %v1596_v58, 0.0  ;;  %v4130_v5 = vadd.f32 %v1431_v0, %v5257_v44  ;;  %v1433_v19 = vpop.f32.mrb[33].mxu0  ;;  %1884 = vmatprep.mubr.f32.mxu1 %v6392_v63 }
 0x2ae   :  { %v1653_v42 = vmax.f32 %v1597_v40, 0.0  ;;  %v4131_v48 = vadd.f32 %v1433_v19, %v5259_v45 }
 0x2af   :  { %v1598_v4 = vadd.f32 %v4130_v5, %v5320_v1 }
 0x2b0   :  { %v1693_v43 = vmax.f32 %v1652_v26, %v1653_v42  ;;  %v1599_v10 = vadd.f32 %v4131_v48, %v5322_v2  ;;  %v1437_v23 = vpop.f32.mrb[34].mxu0 }
 0x2b1   :  { %v1654_v11 = vmax.f32 %v1598_v4, 0.0  ;;  %v4132_v28 = vadd.f32 %v1437_v23, %v5267_v50  ;;  %v1439_v55 = vpop.f32.mrb[35].mxu0 }
 0x2b2   :  { %v5507_v17 = vmax.f32 %v1692_v59, %v1693_v43  ;;  %v1655_v29 = vmax.f32 %v1599_v10, 0.0  ;;  %v4133_v44 = vadd.f32 %v1439_v55, %v5269_v51 }
 0x2b3   :  { %v1600_v56 = vadd.f32 %v4132_v28, %v5320_v1 }
 0x2b4   :  { %v1694_v24 = vmax.f32 %v1654_v11, %v1655_v29  ;;  %v1601_v45 = vadd.f32 %v4133_v44, %v5322_v2  ;;  %v1443_v12 = vpop.f32.mrb[36].mxu0  ;;  %1885 = vmatmul.mubr.f32.gmra.mrb[56].mxu1 %v5507_v17 }
 0x2b5   :  { %v1656_v18 = vmax.f32 %v1600_v56, 0.0  ;;  %v4134_v61 = vadd.f32 %v1443_v12, %v5271_v52  ;;  %v1445_v30 = vpop.f32.mrb[37].mxu0  ;;  %1890 = vmatprep.mubr.f32.mxu1 %v6392_v63 }
 0x2b6   :  { %v1657_v50 = vmax.f32 %v1601_v45, 0.0  ;;  %v4135_v21 = vadd.f32 %v1445_v30, %v5273_v53 }
 0x2b7   :  { %v1602_v13 = vadd.f32 %v4134_v61, %v5320_v1 }
 0x2b8   :  { %v1695_v51 = vmax.f32 %v1656_v18, %v1657_v50  ;;  %v1603_v32 = vadd.f32 %v4135_v21, %v5322_v2  ;;  %v1449_v47 = vpop.f32.mrb[38].mxu0 }
 0x2b9   :  { %v1658_v60 = vmax.f32 %v1602_v13, 0.0  ;;  %v4136_v22 = vadd.f32 %v1449_v47, %v5275_v6  ;;  %v1451_v25 = vpop.f32.mrb[39].mxu0 }
 0x2ba   :  { %v5519_v9 = vmax.f32 %v1694_v24, %v1695_v51  ;;  %v1659_v16 = vmax.f32 %v1603_v32, 0.0  ;;  %v4137_v52 = vadd.f32 %v1451_v25, %v5277_v7  ;;  %v2034_v32 = vld [vmem:[%s6375_s2 + $0x200] sm:$0xff] }
 0x2bb   :  { %v1604_v39 = vadd.f32 %v4136_v22, %v5320_v1 }
 0x2bc   :  { %v1696_v58 = vmax.f32 %v1658_v60, %v1659_v16  ;;  %v1605_v53 = vadd.f32 %v4137_v52, %v5322_v2  ;;  %v1455_v59 = vpop.f32.mrb[40].mxu0  ;;  %1891 = vmatmul.mubr.f32.gmra.mrb[58].mxu1 %v5519_v9  ;;  %v2041_v60 = vld [vmem:[%s6375_s2 + $0x238] sm:$0xff] }
 0x2bd   :  { %v1660_v40 = vmax.f32 %v1604_v39, 0.0  ;;  %v4138_v0 = vadd.f32 %v1455_v59, %v5279_v8  ;;  %v1457_v26 = vpop.f32.mrb[41].mxu0  ;;  %1896 = vmatprep.mubr.f32.mxu1 %v6392_v63 }
 0x2be   :  { %v1661_v6 = vmax.f32 %v1605_v53, 0.0  ;;  %v4139_v5 = vadd.f32 %v1457_v26, %v5281_v27  ;;  %v2040_v26 = vld [vmem:[%s6375_s2 + $0x230] sm:$0xff] }
 0x2bf   :  { %v1606_v19 = vadd.f32 %v4138_v0, %v5320_v1  ;;  %v2038_v0 = vld [vmem:[%s6375_s2 + $0x220] sm:$0xff] }
 0x2c0   :  { %v1697_v7 = vmax.f32 %v1660_v40, %v1661_v6  ;;  %v1607_v42 = vadd.f32 %v4139_v5, %v5322_v2  ;;  %v1461_v48 = vpop.f32.mrb[42].mxu0  ;;  %v2045_v5 = vld [vmem:[%s6375_s2 + $0x258] sm:$0xff] }
 0x2c1   :  { %v1662_v4 = vmax.f32 %v1606_v19, 0.0  ;;  %v4140_v43 = vadd.f32 %v1461_v48, %v5283_v31  ;;  %v1463_v10 = vpop.f32.mrb[43].mxu0 }
 0x2c2   :  { %v5531_v23 = vmax.f32 %v1696_v58, %v1697_v7  ;;  %v1663_v11 = vmax.f32 %v1607_v42, 0.0  ;;  %v4141_v8 = vadd.f32 %v1463_v10, %v5285_v33  ;;  %v6393_v42 = vmax.f32 %v5327_v46, %v5331_v3  ;;  %v2044_v46 = vld [vmem:[%s6375_s2 + $0x250] sm:$0xff] }
 0x2c3   :  { %v1608_v28 = vadd.f32 %v4140_v43, %v5320_v1  ;;  %v3860_v10 = vpack.c.bf16 %v2040_v26, %v2038_v0  ;;  %v2050_v0 = vld [vmem:[%s6375_s2 + $0x280] sm:$0xff]  ;;  %v2052_v26 = vld [vmem:[%s6375_s2 + $0x290] sm:$0xff] }
 0x2c4   :  { %v1698_v55 = vmax.f32 %v1662_v4, %v1663_v11  ;;  %v1609_v27 = vadd.f32 %v4141_v8, %v5322_v2  ;;  %v1467_v29 = vpop.f32.mrb[44].mxu0  ;;  %1897 = vmatmul.mubr.f32.gmra.mrb[60].mxu1 %v5531_v23 }
 0x2c5   :  { %v1664_v44 = vmax.f32 %v1608_v28, 0.0  ;;  %v4142_v56 = vadd.f32 %v1467_v29, %v5287_v34  ;;  %v1469_v24 = vpop.f32.mrb[45].mxu0  ;;  %1902 = vmatprep.mubr.f32.mxu1 %v6392_v63 }
 0x2c6   :  { %v1665_v31 = vmax.f32 %v1609_v27, 0.0  ;;  %v4143_v45 = vadd.f32 %v1469_v24, %v5289_v35  ;;  %v2036_v35 = vld [vmem:[%s6375_s2 + $0x210] sm:$0xff]  ;;  %v2047_v27 = vld [vmem:[%s6375_s2 + $0x268] sm:$0xff] }
 0x2c7   :  { %v1610_v12 = vadd.f32 %v4142_v56, %v5320_v1  ;;  %v3856_v58 = vpack.c.bf16 %v2036_v35, %v2034_v32  ;;  %v6394_v24 = vld [vmem:[#allocation13_spill] sm:$0xff]  ;;  %v2051_v35 = vld [vmem:[%s6375_s2 + $0x288] sm:$0xff] }
 0x2c8   :  { %v1699_v33 = vmax.f32 %v1664_v44, %v1665_v31  ;;  %v1611_v18 = vadd.f32 %v4143_v45, %v5322_v2  ;;  %v1473_v61 = vpop.f32.mrb[46].mxu0  ;;  %v6395_v45 = vld [vmem:[#allocation8_spill] sm:$0xff] }
 0x2c9   :  { %v1666_v30 = vmax.f32 %v1610_v12, 0.0  ;;  %v4144_v50 = vadd.f32 %v1473_v61, %v5291_v36  ;;  %v1475_v21 = vpop.f32.mrb[47].mxu0  ;;  %v2039_v36 = vld [vmem:[%s6375_s2 + $0x228] sm:$0xff] }
 0x2ca   :  { %v5543_v13 = vmax.f32 %v1698_v55, %v1699_v33  ;;  %v1667_v51 = vmax.f32 %v1611_v18, 0.0  ;;  %v4145_v34 = vadd.f32 %v1475_v21, %v5293_v37  ;;  %v3858_v40 = vpack.c.bf16 %v2041_v60, %v2039_v36  ;;  %v2042_v55 = vld [vmem:[%s6375_s2 + $0x240] sm:$0xff] }
 0x2cb   :  { %v1612_v47 = vadd.f32 %v4144_v50, %v5320_v1  ;;  %v3864_v18 = vpack.c.bf16 %v2044_v46, %v2042_v55  ;;  %v2058_v46 = vld [vmem:[%s6375_s2 + $0x2c0] sm:$0xff] }
 0x2cc   :  { %v1700_v22 = vmax.f32 %v1666_v30, %v1667_v51  ;;  %v1613_v37 = vadd.f32 %v4145_v34, %v5322_v2  ;;  %v1479_v25 = vpop.f32.mrb[48].mxu0  ;;  %1903 = vmatmul.mubr.f32.gmra.mrb[62].mxu1 %v5543_v13  ;;  %v6396_v30 = vld [vmem:[#allocation9_spill] sm:$0xff]  ;;  %v2046_v51 = vld [vmem:[%s6375_s2 + $0x260] sm:$0xff] }
 0x2cd   :  { %v1668_v16 = vmax.f32 %v1612_v47, 0.0  ;;  %v4146_v52 = vadd.f32 %v1479_v25, %v5295_v38  ;;  %v1481_v39 = vpop.f32.mrb[49].mxu0  ;;  %1973 = vmatprep.mubr.f32.mxu1 %v6392_v63  ;;  %v2043_v38 = vld [vmem:[%s6375_s2 + $0x248] sm:$0xff]  ;;  %v2048_v34 = vld [vmem:[%s6375_s2 + $0x270] sm:$0xff]  ;;  %v2053_v47 = vld [vmem:[%s6375_s2 + $0x298] sm:$0xff] }
 0x2ce   :  { %v1669_v53 = vmax.f32 %v1613_v37, 0.0  ;;  %v4147_v59 = vadd.f32 %v1481_v39, %v5297_v41  ;;  %v3862_v28 = vpack.c.bf16 %v2045_v5, %v2043_v38  ;;  %v6397_v25 = vld [vmem:[#allocation10_spill] sm:$0xff]  ;;  %v3868_v39 = vpack.c.bf16 %v2048_v34, %v2046_v51  ;;  %v2055_v5 = vld [vmem:[%s6375_s2 + $0x2a8] sm:$0xff] }
 0x2cf   :  { %v1614_v6 = vadd.f32 %v4146_v52, %v5320_v1 }
 0x2d0   :  { %v1701_v41 = vmax.f32 %v1668_v16, %v1669_v53  ;;  %v1615_v19 = vadd.f32 %v4147_v59, %v5322_v2  ;;  %v1485_v7 = vpop.f32.mrb[50].mxu0  ;;  %1974 = vmatmul.mubr.f32.vlgmr.msra.gmra.mrb[44].mxu1 %v6393_v42  ;;  %v6398_v53 = vld [vmem:[#allocation11_spill] sm:$0xff] }
 0x2d1   :  { %v1670_v48 = vmax.f32 %v1614_v6, 0.0  ;;  %v4148_v4 = vadd.f32 %v1485_v7, %v5299_v49  ;;  %v1487_v43 = vpop.f32.mrb[51].mxu0  ;;  %3857 = vmatpush1.bf16.msra.mxu1 %v3856_v58  ;;  %1979 = vmatprep.mubr.f32.mxu1 %v6392_v63 }
 0x2d2   :  { %v1671_v11 = vmax.f32 %v1615_v19, 0.0  ;;  %v4149_v8 = vadd.f32 %v1487_v43, %v5301_v54  ;;  %3859 = vmatprep.subr.bf16.mxu1 %v3858_v40  ;;  %v5590_v3 = vmax.f32 %v1700_v22, %v1701_v41  ;;  %v2049_v54 = vld [vmem:[%s6375_s2 + $0x278] sm:$0xff]  ;;  %v3870_v40 = vpack.c.bf16 %v2053_v47, %v2051_v35  ;;  %v2054_v43 = vld [vmem:[%s6375_s2 + $0x2a0] sm:$0xff]  ;;  %v2217_v35 = vld [vmem:[%s6375_s2 + $0x330] sm:$0xff] }
 0x2d3   :  { %v1616_v49 = vadd.f32 %v4148_v4, %v5320_v1  ;;  %v3866_v21 = vpack.c.bf16 %v2049_v54, %v2047_v27  ;;  %v2057_v41 = vld [vmem:[%s6375_s2 + $0x2b8] sm:$0xff]  ;;  %v2063_v54 = vld [vmem:[%s6375_s2 + $0x2e8] sm:$0xff] }
 0x2d4   :  { %v1702_v29 = vmax.f32 %v1670_v48, %v1671_v11  ;;  %v1617_v44 = vadd.f32 %v4149_v8, %v5322_v2  ;;  %v1491_v56 = vpop.f32.mrb[52].mxu0  ;;  %1980 = vmatmul.mubr.f32.gmra.mrb[46].mxu1 %v6394_v24  ;;  %v3872_v48 = vpack.c.bf16 %v2052_v26, %v2050_v0  ;;  %v3874_v4 = vpack.c.bf16 %v2057_v41, %v2055_v5  ;;  %v2061_v11 = vld [vmem:[%s6375_s2 + $0x2d8] sm:$0xff]  ;;  %v2062_v24 = vld [vmem:[%s6375_s2 + $0x2e0] sm:$0xff]  ;;  %v2220_v47 = vld [vmem:[%s6375_s2 + $0x348] sm:$0xff] }
 0x2d5   :  { %v1672_v31 = vmax.f32 %v1616_v49, 0.0  ;;  %v4150_v12 = vadd.f32 %v1491_v56, %v6395_v45  ;;  %v1493_v33 = vpop.f32.mrb[53].mxu0  ;;  %3861 = vmatpush1.bf16.msra.mxu1 %v3860_v10  ;;  %1985 = vmatprep.mubr.f32.mxu1 %v6392_v63  ;;  %v2056_v10 = vld [vmem:[%s6375_s2 + $0x2b0] sm:$0xff]  ;;  %v2212_v45 = vld [vmem:[%s6375_s2 + $0x308] sm:$0xff] }
 0x2d6   :  { %v1673_v61 = vmax.f32 %v1617_v44, 0.0  ;;  %v4151_v50 = vadd.f32 %v1493_v33, %v6396_v30  ;;  %3863 = vmatprep.subr.bf16.mxu1 %v3862_v28  ;;  %v3876_v28 = vpack.c.bf16 %v2056_v10, %v2054_v43  ;;  %v2060_v49 = vld [vmem:[%s6375_s2 + $0x2d0] sm:$0xff]  ;;  %v2232_v41 = vld [vmem:[%s6375_s2 + $0x3a8] sm:$0xff]  ;;  %v2238_v10 = vld [vmem:[%s6375_s2 + $0x3d8] sm:$0xff] }
 0x2d7   :  { %v1618_v32 = vadd.f32 %v4150_v12, %v5320_v1  ;;  %v3880_v44 = vpack.c.bf16 %v2060_v49, %v2058_v46  ;;  %v2214_v12 = vld [vmem:[%s6375_s2 + $0x318] sm:$0xff]  ;;  %v2213_v30 = vld [vmem:[%s6375_s2 + $0x310] sm:$0xff]  ;;  %v2236_v43 = vld [vmem:[%s6375_s2 + $0x3c8] sm:$0xff] }
 0x2d8   :  { %v1703_v36 = vmax.f32 %v1672_v31, %v1673_v61  ;;  %v1619_v60 = vadd.f32 %v4151_v50, %v5322_v2  ;;  %v1497_v22 = vpop.f32.mrb[54].mxu0  ;;  %1986 = vmatmul.mubr.f32.gmra.mrb[48].mxu1 %v5386_v15  ;;  %v2064_v31 = vld [vmem:[%s6375_s2 + $0x2f0] sm:$0xff]  ;;  %v2211_v61 = vld [vmem:[%s6375_s2 + $0x300] sm:$0xff]  ;;  %v2216_v50 = vld [vmem:[%s6375_s2 + $0x328] sm:$0xff] }
 0x2d9   :  { %v1674_v37 = vmax.f32 %v1618_v32, 0.0  ;;  %v4152_v16 = vadd.f32 %v1497_v22, %v6397_v25  ;;  %v1499_v52 = vpop.f32.mrb[55].mxu0  ;;  %1991 = vmatprep.mubr.f32.mxu1 %v6392_v63  ;;  %3865 = vmatpush1.bf16.msra.mxu1 %v3864_v18  ;;  %v3884_v33 = vpack.c.bf16 %v2064_v31, %v2062_v24  ;;  %v3886_v18 = vpack.c.bf16 %v2214_v12, %v2212_v45  ;;  %v2215_v32 = vld [vmem:[%s6375_s2 + $0x320] sm:$0xff]  ;;  %v2221_v25 = vld [vmem:[%s6375_s2 + $0x350] sm:$0xff]  ;;  %v2240_v46 = vld [vmem:[%s6375_s2 + $0x3e8] sm:$0xff] }
 0x2da   :  { %v1675_v58 = vmax.f32 %v1619_v60, 0.0  ;;  %v4153_v59 = vadd.f32 %v1499_v52, %v6398_v53  ;;  %3867 = vmatprep.subr.bf16.mxu1 %v3866_v21  ;;  %v5628_v6 = vmax.f32 %v1702_v29, %v1703_v36  ;;  %v2065_v29 = vld [vmem:[%s6375_s2 + $0x2f8] sm:$0xff]  ;;  %v3888_v51 = vpack.c.bf16 %v2213_v30, %v2211_v61  ;;  %v2225_v53 = vld [vmem:[%s6375_s2 + $0x370] sm:$0xff]  ;;  %v2389_v24 = vld [vmem:[%s6375_s2 + $0x408] sm:$0xff] }
 0x2db   :  { %v1620_v38 = vadd.f32 %v4152_v16, %v5320_v1  ;;  %v3882_v56 = vpack.c.bf16 %v2065_v29, %v2063_v54  ;;  %v2218_v21 = vld [vmem:[%s6375_s2 + $0x338] sm:$0xff]  ;;  %v3892_v60 = vpack.c.bf16 %v2217_v35, %v2215_v32  ;;  %v2224_v16 = vld [vmem:[%s6375_s2 + $0x368] sm:$0xff]  ;;  %v2229_v5 = vld [vmem:[%s6375_s2 + $0x390] sm:$0xff] }
 0x2dc   :  { %v5637_v19 = vmax.f32 %v1674_v37, %v1675_v58  ;;  %v1621_v7 = vadd.f32 %v4153_v59, %v5322_v2  ;;  %1992 = vmatmul.mubr.f32.gmra.mrb[50].mxu1 %v5435_v57  ;;  %v2059_v2 = vld [vmem:[%s6375_s2 + $0x2c8] sm:$0xff]  ;;  %v3890_v34 = vpack.c.bf16 %v2218_v21, %v2216_v50  ;;  %v2222_v36 = vld [vmem:[%s6375_s2 + $0x358] sm:$0xff]  ;;  %v2219_v37 = vld [vmem:[%s6375_s2 + $0x340] sm:$0xff] }
 0x2dd   :  { %v1676_v42 = vmax.f32 %v1620_v38, 0.0  ;;  %1997 = vmatprep.mubr.f32.mxu1 %v6392_v63  ;;  %3869 = vmatpush1.bf16.msra.mxu1 %v3868_v39  ;;  %v3878_v55 = vpack.c.bf16 %v2061_v11, %v2059_v2  ;;  %v3894_v22 = vpack.c.bf16 %v2222_v36, %v2220_v47  ;;  %v3896_v52 = vpack.c.bf16 %v2221_v25, %v2219_v37  ;;  %v2223_v58 = vld [vmem:[%s6375_s2 + $0x360] sm:$0xff]  ;;  %v2228_v59 = vld [vmem:[%s6375_s2 + $0x388] sm:$0xff]  ;;  %v2242_v49 = vld [vmem:[%s6375_s2 + $0x3f8] sm:$0xff] }
 0x2de   :  { %v1677_v1 = vmax.f32 %v1621_v7, 0.0  ;;  %3871 = vmatprep.subr.bf16.mxu1 %v3870_v40  ;;  %v2230_v40 = vld [vmem:[%s6375_s2 + $0x398] sm:$0xff]  ;;  %v3900_v0 = vpack.c.bf16 %v2225_v53, %v2223_v58  ;;  %v2227_v38 = vld [vmem:[%s6375_s2 + $0x380] sm:$0xff]  ;;  %v3910_v11 = vpack.c.bf16 %v2238_v10, %v2236_v43  ;;  %v3914_v29 = vpack.c.bf16 %v2242_v49, %v2240_v46  ;;  %v2393_v61 = vld [vmem:[%s6375_s2 + $0x428] sm:$0xff] }
 0x2df   :  { %v3902_v26 = vpack.c.bf16 %v2230_v40, %v2228_v59  ;;  %v2234_v7 = vld [vmem:[%s6375_s2 + $0x3b8] sm:$0xff]  ;;  %v2397_v32 = vld [vmem:[%s6375_s2 + $0x448] sm:$0xff]  ;;  %v2404_v40 = vld [vmem:[%s6375_s2 + $0x480] sm:$0xff] }
 0x2e0   :  { %v5654_v8 = vmax.f32 %v1676_v42, %v1677_v1  ;;  %1998 = vmatmul.mubr.f32.gmra.mrb[52].mxu1 %v5471_v14  ;;  %v3904_v42 = vpack.c.bf16 %v2229_v5, %v2227_v38  ;;  %v2231_v1 = vld [vmem:[%s6375_s2 + $0x3a0] sm:$0xff]  ;;  %v2391_v31 = vld [vmem:[%s6375_s2 + $0x418] sm:$0xff]  ;;  %v2401_v37 = vld [vmem:[%s6375_s2 + $0x468] sm:$0xff] }
 0x2e1   :  { %2003 = vmatprep.mubr.f32.mxu1 %v6392_v63  ;;  %3873 = vmatpush1.bf16.msra.mxu1 %v3872_v48  ;;  %v3906_v48 = vpack.c.bf16 %v2234_v7, %v2232_v41  ;;  %v3918_v12 = vpack.c.bf16 %v2391_v31, %v2389_v24  ;;  %v2395_v30 = vld [vmem:[%s6375_s2 + $0x438] sm:$0xff]  ;;  %v2408_v7 = vld [vmem:[%s6375_s2 + $0x4a0] sm:$0xff]  ;;  %v2645_v24 = vld [vmem:[%s6376_s3 + $0x88] sm:$0xff] }
 0x2e2   :  { %3875 = vmatprep.subr.bf16.mxu1 %v3874_v4  ;;  %v1719_v27 = vmax.f32 %v5637_v19, %v5654_v8  ;;  %v2233_v4 = vld [vmem:[%s6375_s2 + $0x3b0] sm:$0xff]  ;;  %v3922_v21 = vpack.c.bf16 %v2395_v30, %v2393_v61  ;;  %v2399_v35 = vld [vmem:[%s6375_s2 + $0x458] sm:$0xff]  ;;  %v2412_v10 = vld [vmem:[%s6375_s2 + $0x4c0] sm:$0xff] }
 0x2e3   :  { %v3908_v2 = vpack.c.bf16 %v2233_v4, %v2231_v1  ;;  %v3926_v36 = vpack.c.bf16 %v2399_v35, %v2397_v32  ;;  %v2407_v58 = vld [vmem:[%s6375_s2 + $0x498] sm:$0xff]  ;;  %v2416_v49 = vld [vmem:[%s6375_s2 + $0x4e0] sm:$0xff]  ;;  %v2649_v61 = vld [vmem:[%s6376_s3 + $0xa8] sm:$0xff] }
 0x2e4   :  { %2004 = vmatmul.mubr.f32.gmra.mrb[54].mxu1 %v5483_v20  ;;  %v2411_v38 = vld [vmem:[%s6375_s2 + $0x4b8] sm:$0xff]  ;;  %v2650_v30 = vld [vmem:[%s6376_s3 + $0xb0] sm:$0xff]  ;;  %v2657_v19 = vld [vmem:[%s6376_s3 + $0xe8] sm:$0xff] }
 0x2e5   :  { %2009 = vmatprep.mubr.f32.mxu1 %v6392_v63  ;;  %3877 = vmatpush1.bf16.msra.mxu1 %v3876_v28  ;;  %v2235_v28 = vld [vmem:[%s6375_s2 + $0x3c0] sm:$0xff]  ;;  %v2415_v1 = vld [vmem:[%s6375_s2 + $0x4d8] sm:$0xff] }
 0x2e6   :  { %3879 = vmatprep.subr.bf16.mxu1 %v3878_v55  ;;  %v2237_v55 = vld [vmem:[%s6375_s2 + $0x3d0] sm:$0xff]  ;;  %v6004_v35 = vld [vmem:[%s6379_s6] sm:$0xff] }
 0x2e7   :  { %v3912_v54 = vpack.c.bf16 %v2237_v55, %v2235_v28  ;;  %v2419_v28 = vld [vmem:[%s6375_s2 + $0x4f8] sm:$0xff] }
 0x2e8   :  { %2010 = vmatmul.mubr.f32.gmra.mrb[56].mxu1 %v5495_v62 }
 0x2e9   :  { %2015 = vmatprep.mubr.f32.mxu1 %v6392_v63  ;;  %3881 = vmatpush1.bf16.msra.mxu1 %v3880_v44  ;;  %v2239_v44 = vld [vmem:[%s6375_s2 + $0x3e0] sm:$0xff] }
 0x2ea   :  { %3883 = vmatprep.subr.bf16.mxu1 %v3882_v56  ;;  %v2241_v56 = vld [vmem:[%s6375_s2 + $0x3f0] sm:$0xff] }
 0x2eb   :  { %v3916_v45 = vpack.c.bf16 %v2241_v56, %v2239_v44  ;;  %v4480_v44 = vmov 0.0|0.0   ;;  %v2644_v56 = vld [vmem:[%s6376_s3 + $0x80] sm:$0xff] }
 0x2ec   :  { %2016 = vmatmul.mubr.f32.gmra.mrb[58].mxu1 %v5507_v17  ;;  %v3951_v31 = vpack.c.bf16 %v2645_v24, %v2644_v56 }
 0x2ed   :  { %2021 = vmatprep.mubr.f32.mxu1 %v6392_v63  ;;  %3885 = vmatpush1.bf16.msra.mxu1 %v3884_v33  ;;  %v2388_v33 = vld [vmem:[%s6375_s2 + $0x400] sm:$0xff] }
 0x2ee   :  { %3887 = vmatprep.subr.bf16.mxu1 %v3886_v18  ;;  %v2390_v18 = vld [vmem:[%s6375_s2 + $0x410] sm:$0xff] }
 0x2ef   :  { %v3920_v50 = vpack.c.bf16 %v2390_v18, %v2388_v33  ;;  %v2648_v18 = vld [vmem:[%s6376_s3 + $0xa0] sm:$0xff] }
 0x2f0   :  { %2022 = vmatmul.mubr.f32.gmra.mrb[60].mxu1 %v5519_v9 }
 0x2f1   :  { %2027 = vmatprep.mubr.f32.mxu1 %v6392_v63 }
 0x2f4   :  { %2028 = vmatmul.mubr.f32.gmra.mrb[62].mxu1 %v5531_v23 }
 0x2f5   :  { %2130 = vmatprep.mubr.f32.mxu1 %v6392_v63 }
 0x2f8   :  { %2131 = vmatmul.mubr.f32.vlgmr.msra.gmra.mrb[44].mxu1 %v5386_v15  ;;  %v2226_v15 = vld [vmem:[%s6375_s2 + $0x378] sm:$0xff] }
 0x2f9   :  { %3889 = vmatpush1.bf16.msra.mxu1 %v3888_v51  ;;  %2136 = vmatprep.mubr.f32.mxu1 %v6392_v63  ;;  %v3898_v39 = vpack.c.bf16 %v2226_v15, %v2224_v16  ;;  %v2392_v51 = vld [vmem:[%s6375_s2 + $0x420] sm:$0xff] }
 0x2fa   :  { %3891 = vmatprep.subr.bf16.mxu1 %v3890_v34  ;;  %v2394_v34 = vld [vmem:[%s6375_s2 + $0x430] sm:$0xff]  ;;  %v2400_v15 = vld [vmem:[%s6375_s2 + $0x460] sm:$0xff] }
 0x2fb   :  { %v3924_v47 = vpack.c.bf16 %v2394_v34, %v2392_v51  ;;  %v6399_v34 = vld [vmem:[#allocation12_spill] sm:$0xff] }
 0x2fc   :  { %2137 = vmatmul.mubr.f32.gmra.mrb[46].mxu1 %v5435_v57  ;;  %v2567_v32 = vsub.s32 1, %v6399_v34 }
 0x2fd   :  { %3893 = vmatpush1.bf16.msra.mxu1 %v3892_v60  ;;  %2142 = vmatprep.mubr.f32.mxu1 %v6392_v63  ;;  %v2396_v60 = vld [vmem:[%s6375_s2 + $0x440] sm:$0xff] }
 0x2fe   :  { %3895 = vmatprep.subr.bf16.mxu1 %v3894_v22  ;;  %v2398_v22 = vld [vmem:[%s6375_s2 + $0x450] sm:$0xff] }
 0x2ff   :  { %v3928_v25 = vpack.c.bf16 %v2398_v22, %v2396_v60 }
 0x300   :  { %2143 = vmatmul.mubr.f32.gmra.mrb[48].mxu1 %v5471_v14 }
 0x301   :  { %2148 = vmatprep.mubr.f32.mxu1 %v6392_v63  ;;  %3897 = vmatpush1.bf16.msra.mxu1 %v3896_v52  ;;  %v2402_v52 = vld [vmem:[%s6375_s2 + $0x470] sm:$0xff] }
 0x302   :  { %3899 = vmatprep.subr.bf16.mxu1 %v3898_v39  ;;  %v2405_v39 = vld [vmem:[%s6375_s2 + $0x488] sm:$0xff]  ;;  %v3932_v53 = vpack.c.bf16 %v2402_v52, %v2400_v15 }
 0x303   :  { %v3934_v59 = vpack.c.bf16 %v2407_v58, %v2405_v39 }
 0x304   :  { %2149 = vmatmul.mubr.f32.gmra.mrb[50].mxu1 %v5483_v20 }
 0x305   :  { %2154 = vmatprep.mubr.f32.mxu1 %v6392_v63  ;;  %3901 = vmatpush1.bf16.msra.mxu1 %v3900_v0  ;;  %v2406_v0 = vld [vmem:[%s6375_s2 + $0x490] sm:$0xff] }
 0x306   :  { %3903 = vmatprep.subr.bf16.mxu1 %v3902_v26  ;;  %v2409_v26 = vld [vmem:[%s6375_s2 + $0x4a8] sm:$0xff]  ;;  %v3936_v5 = vpack.c.bf16 %v2406_v0, %v2404_v40 }
 0x307   :  { %v3938_v41 = vpack.c.bf16 %v2411_v38, %v2409_v26 }
 0x308   :  { %2155 = vmatmul.mubr.f32.gmra.mrb[52].mxu1 %v5495_v62 }
 0x309   :  { %2160 = vmatprep.mubr.f32.mxu1 %v6392_v63  ;;  %3905 = vmatpush1.bf16.msra.mxu1 %v3904_v42  ;;  %v2410_v42 = vld [vmem:[%s6375_s2 + $0x4b0] sm:$0xff] }
 0x30a   :  { %3907 = vmatprep.subr.bf16.mxu1 %v3906_v48  ;;  %v2413_v48 = vld [vmem:[%s6375_s2 + $0x4c8] sm:$0xff]  ;;  %v3940_v4 = vpack.c.bf16 %v2410_v42, %v2408_v7 }
 0x30b   :  { %v3942_v43 = vpack.c.bf16 %v2415_v1, %v2413_v48 }
 0x30c   :  { %2161 = vmatmul.mubr.f32.gmra.mrb[54].mxu1 %v5507_v17 }
 0x30d   :  { %2166 = vmatprep.mubr.f32.mxu1 %v6392_v63  ;;  %3909 = vmatpush1.bf16.msra.mxu1 %v3908_v2  ;;  %v2414_v2 = vld [vmem:[%s6375_s2 + $0x4d0] sm:$0xff] }
 0x30e   :  { %3911 = vmatprep.subr.bf16.mxu1 %v3910_v11  ;;  %v2417_v11 = vld [vmem:[%s6375_s2 + $0x4e8] sm:$0xff]  ;;  %v3944_v55 = vpack.c.bf16 %v2414_v2, %v2412_v10 }
 0x30f   :  { %v3946_v46 = vpack.c.bf16 %v2419_v28, %v2417_v11 }
 0x310   :  { %2167 = vmatmul.mubr.f32.gmra.mrb[56].mxu1 %v5519_v9 }
 0x311   :  { %2172 = vmatprep.mubr.f32.mxu1 %v6392_v63  ;;  %3913 = vmatpush1.bf16.msra.mxu1 %v3912_v54  ;;  %v2418_v54 = vld [vmem:[%s6375_s2 + $0x4f0] sm:$0xff] }
 0x312   :  { %3915 = vmatprep.subr.bf16.mxu1 %v3914_v29  ;;  %v3948_v29 = vpack.c.bf16 %v2418_v54, %v2416_v49  ;;  %v2628_v49 = vld [vmem:[%s6376_s3] sm:$0xff]  ;;  %v2629_v54 = vld [vmem:[%s6376_s3 + $0x8] sm:$0xff] }
 0x314   :  { %2173 = vmatmul.mubr.f32.gmra.mrb[58].mxu1 %v5531_v23 }
 0x315   :  { %2178 = vmatprep.mubr.f32.mxu1 %v6392_v63  ;;  %3917 = vmatpush1.bf16.msra.mxu1 %v3916_v45  ;;  %v2646_v45 = vld [vmem:[%s6376_s3 + $0x90] sm:$0xff] }
 0x316   :  { %3919 = vmatprep.subr.bf16.mxu1 %v3918_v12  ;;  %v2647_v12 = vld [vmem:[%s6376_s3 + $0x98] sm:$0xff] }
 0x317   :  { %v3954_v33 = vpack.c.bf16 %v2647_v12, %v2646_v45  ;;  %v3975_v12 = vpack.c.bf16 %v2629_v54, %v2628_v49 }
 0x318   :  { %2179 = vmatmul.mubr.f32.gmra.mrb[60].mxu1 %v5543_v13 }
 0x319   :  { %2184 = vmatprep.mubr.f32.mxu1 %v6392_v63 }
 0x31c   :  { %2185 = vmatmul.mubr.f32.gmra.mrb[62].mxu1 %v5590_v3 }
 0x31d   :  { %2307 = vmatprep.mubr.f32.mxu1 %v6392_v63 }
 0x320   :  { %2308 = vmatmul.mubr.f32.vlgmr.msra.gmra.mrb[44].mxu1 %v5435_v57  ;;  %v2403_v57 = vld [vmem:[%s6375_s2 + $0x478] sm:$0xff] }
 0x321   :  { %3921 = vmatpush1.bf16.msra.mxu1 %v3920_v50  ;;  %2313 = vmatprep.mubr.f32.mxu1 %v6392_v63  ;;  %v3930_v16 = vpack.c.bf16 %v2403_v57, %v2401_v37  ;;  %v2651_v50 = vld [vmem:[%s6376_s3 + $0xb8] sm:$0xff] }
 0x322   :  { %3923 = vmatprep.subr.bf16.mxu1 %v3922_v21  ;;  %v2659_v21 = vld [vmem:[%s6376_s3 + $0xf8] sm:$0xff] }
 0x324   :  { %2314 = vmatmul.mubr.f32.gmra.mrb[46].mxu1 %v5471_v14 }
 0x325   :  { %3925 = vmatpush1.bf16.msra.mxu1 %v3924_v47  ;;  %2319 = vmatprep.mubr.f32.mxu1 %v6392_v63  ;;  %v6007_v47 = vrot.slane %v6004_v35, %v2567_v32 }
 0x326   :  { %3927 = vmatprep.subr.bf16.mxu1 %v3926_v36  ;;  %v4424_v36 = vld [vmem:[%s6379_s6 + $0x8] sm:$0xff] }
 0x327   :  { %v6012_v60 = vrot.slane %v4424_v36, %v2567_v32 }
 0x328   :  { %2320 = vmatmul.mubr.f32.gmra.mrb[48].mxu1 %v5483_v20 }
 0x329   :  { %2325 = vmatprep.mubr.f32.mxu1 %v6392_v63  ;;  %3929 = vmatpush1.bf16.msra.mxu1 %v3928_v25 }
 0x32a   :  { %3931 = vmatprep.subr.bf16.mxu1 %v3930_v16 }
 0x32c   :  { %2326 = vmatmul.mubr.f32.gmra.mrb[50].mxu1 %v5495_v62 }
 0x32d   :  { %2331 = vmatprep.mubr.f32.mxu1 %v6392_v63  ;;  %3933 = vmatpush1.bf16.msra.mxu1 %v3932_v53 }
 0x32e   :  { %3935 = vmatprep.subr.bf16.mxu1 %v3934_v59 }
 0x330   :  { %2332 = vmatmul.mubr.f32.gmra.mrb[52].mxu1 %v5507_v17 }
 0x331   :  { %2337 = vmatprep.mubr.f32.mxu1 %v6392_v63  ;;  %3937 = vmatpush1.bf16.msra.mxu1 %v3936_v5 }
 0x332   :  { %3939 = vmatprep.subr.bf16.mxu1 %v3938_v41 }
 0x334   :  { %2338 = vmatmul.mubr.f32.gmra.mrb[54].mxu1 %v5519_v9 }
 0x335   :  { %2343 = vmatprep.mubr.f32.mxu1 %v6392_v63  ;;  %3941 = vmatpush1.bf16.msra.mxu1 %v3940_v4 }
 0x336   :  { %3943 = vmatprep.subr.bf16.mxu1 %v3942_v43 }
 0x338   :  { %2344 = vmatmul.mubr.f32.gmra.mrb[56].mxu1 %v5531_v23 }
 0x339   :  { %2349 = vmatprep.mubr.f32.mxu1 %v6392_v63  ;;  %3945 = vmatpush1.bf16.msra.mxu1 %v3944_v55 }
 0x33a   :  { %3947 = vmatprep.subr.bf16.mxu1 %v3946_v46 }
 0x33c   :  { %2350 = vmatmul.mubr.f32.gmra.mrb[58].mxu1 %v5543_v13 }
 0x33d   :  { %2355 = vmatprep.mubr.f32.mxu1 %v6392_v63  ;;  %3949 = vmatpush1.bf16.msra.mxu1 %v3948_v29 }
 0x33e   :  { %3950 = vmatprep.subr.bf16.mxu1 %v4480_v44 }
 0x340   :  { %2356 = vmatmul.mubr.f32.gmra.mrb[60].mxu1 %v5590_v3 }
 0x341   :  { %2361 = vmatprep.mubr.f32.mxu1 %v6392_v63 }
 0x344   :  { %2362 = vmatmul.mubr.f32.gmra.mrb[62].mxu1 %v5628_v6 }
 0x345   :  { %2484 = vmatprep.mubr.f32.mxu1 %v6392_v63 }
 0x348   :  { %2485 = vmatmul.mubr.f32.vlgmr.msra.gmra.mrb[44].mxu1 %v5471_v14  ;;  %v3957_v14 = vpack.c.bf16 %v2649_v61, %v2648_v18 }
 0x349   :  { %2490 = vmatprep.mubr.f32.mxu1 %v6392_v63  ;;  %3952 = vmatpush3.bf16.msra.mxu1 %v3951_v31 }
 0x34a   :  { %3953 = vmatprep.subr.bf16.mxu1 %v4480_v44 }
 0x34c   :  { %2491 = vmatmul.mubr.f32.gmra.mrb[46].mxu1 %v5483_v20  ;;  %v3960_v20 = vpack.c.bf16 %v2651_v50, %v2650_v30  ;;  %v2631_v30 = vld [vmem:[%s6376_s3 + $0x18] sm:$0xff] }
 0x34d   :  { %2496 = vmatprep.mubr.f32.mxu1 %v6392_v63  ;;  %3955 = vmatpush3.bf16.msra.mxu1 %v3954_v33 }
 0x34e   :  { %3956 = vmatprep.subr.bf16.mxu1 %v4480_v44 }
 0x350   :  { %2497 = vmatmul.mubr.f32.gmra.mrb[48].mxu1 %v5495_v62  ;;  %v2652_v62 = vld [vmem:[%s6376_s3 + $0xc0] sm:$0xff] }
 0x351   :  { %2502 = vmatprep.mubr.f32.mxu1 %v6392_v63  ;;  %3958 = vmatpush3.bf16.msra.mxu1 %v3957_v14  ;;  %v2630_v14 = vld [vmem:[%s6376_s3 + $0x10] sm:$0xff] }
 0x352   :  { %3959 = vmatprep.subr.bf16.mxu1 %v4480_v44 }
 0x354   :  { %2503 = vmatmul.mubr.f32.gmra.mrb[50].mxu1 %v5507_v17  ;;  %v2653_v17 = vld [vmem:[%s6376_s3 + $0xc8] sm:$0xff] }
 0x355   :  { %2508 = vmatprep.mubr.f32.mxu1 %v6392_v63  ;;  %3961 = vmatpush3.bf16.msra.mxu1 %v3960_v20 }
 0x356   :  { %3962 = vmatprep.subr.bf16.mxu1 %v4480_v44 }
 0x358   :  { %2509 = vmatmul.mubr.f32.gmra.mrb[52].mxu1 %v5519_v9  ;;  %v3963_v9 = vpack.c.bf16 %v2653_v17, %v2652_v62 }
 0x359   :  { %2514 = vmatprep.mubr.f32.mxu1 %v6392_v63 }
 0x35a   :  { %3964 = vmatpush3.bf16.msra.mxu1 %v3963_v9 }
 0x35b   :  { %3965 = vmatprep.subr.bf16.mxu1 %v4480_v44 }
 0x35c   :  { %2515 = vmatmul.mubr.f32.gmra.mrb[54].mxu1 %v5531_v23  ;;  %v2654_v23 = vld [vmem:[%s6376_s3 + $0xd0] sm:$0xff] }
 0x35d   :  { %2520 = vmatprep.mubr.f32.mxu1 %v6392_v63 }
 0x360   :  { %2521 = vmatmul.mubr.f32.gmra.mrb[56].mxu1 %v5543_v13  ;;  %v2655_v13 = vld [vmem:[%s6376_s3 + $0xd8] sm:$0xff] }
 0x361   :  { %2526 = vmatprep.mubr.f32.mxu1 %v6392_v63 }
 0x364   :  { %2527 = vmatmul.mubr.f32.gmra.mrb[58].mxu1 %v5590_v3  ;;  %v3966_v3 = vpack.c.bf16 %v2655_v13, %v2654_v23  ;;  %v3978_v23 = vpack.c.bf16 %v2631_v30, %v2630_v14  ;;  %v2643_v14 = vld [vmem:[%s6376_s3 + $0x78] sm:$0xff] }
 0x365   :  { %2532 = vmatprep.mubr.f32.mxu1 %v6392_v63 }
 0x366   :  { %3967 = vmatpush3.bf16.msra.mxu1 %v3966_v3 }
 0x367   :  { %3968 = vmatprep.subr.bf16.mxu1 %v4480_v44 }
 0x368   :  { %2533 = vmatmul.mubr.f32.gmra.mrb[60].mxu1 %v5628_v6  ;;  %v2656_v6 = vld [vmem:[%s6376_s3 + $0xe0] sm:$0xff] }
 0x369   :  { %2538 = vmatprep.mubr.f32.mxu1 %v6392_v63  ;;  %v3969_v8 = vpack.c.bf16 %v2657_v19, %v2656_v6  ;;  %v2632_v6 = vld [vmem:[%s6376_s3 + $0x20] sm:$0xff]  ;;  %v2633_v19 = vld [vmem:[%s6376_s3 + $0x28] sm:$0xff] }
 0x36a   :  { %v3981_v36 = vpack.c.bf16 %v2633_v19, %v2632_v6  ;;  %v2805_v6 = vld [vmem:[%s6376_s3 + $0x128] sm:$0xff] }
 0x36b   :  { %3970 = vmatpush3.bf16.msra.mxu1 %v3969_v8 }
 0x36c   :  { %2539 = vmatmul.mubr.f32.gmra.mrb[62].mxu1 %v1719_v27  ;;  %3971 = vmatprep.subr.bf16.mxu1 %v4480_v44  ;;  %v2658_v27 = vld [vmem:[%s6376_s3 + $0xf0] sm:$0xff] }
 0x36d   :  { %v3972_v51 = vpack.c.bf16 %v2659_v21, %v2658_v27  ;;  %3549 = vmatprep.mubr.msk.f32.mxu1 %vm4481_vm1, %v6392_v63 }
 0x36f   :  { %3973 = vmatpush3.bf16.msra.mxu1 %v3972_v51 }
 0x370   :  { %3974 = vmatprep.subr.bf16.mxu1 %v4480_v44 }
 0x41b   :  { %v2486_v22 = vpop.f32.mrb[44].mxu1 }
 0x41c   :  { %v2573_v37 = vadd.f32 %v6007_v47, %v2486_v22  ;;  %v2488_v57 = vpop.f32.mrb[45].mxu1 }
 0x41d   :  { %v2574_v25 = vadd.f32 %v6012_v60, %v2488_v57 }
 0x41e   :  { %v2593_v16 = vmax.f32 %v2573_v37, 0.0 }
 0x41f   :  { %v2594_v15 = vmax.f32 %v2574_v25, 0.0  ;;  %v2492_v52 = vpop.f32.mrb[46].mxu1  ;;  %v2634_v25 = vld [vmem:[%s6376_s3 + $0x30] sm:$0xff] }
 0x420   :  { %v2575_v39 = vadd.f32 %v6007_v47, %v2492_v52  ;;  %v2494_v58 = vpop.f32.mrb[47].mxu1 }
 0x421   :  { %v6017_v53 = vmax.f32 %v2593_v16, %v2594_v15  ;;  %v2576_v59 = vadd.f32 %v6012_v60, %v2494_v58  ;;  %v2635_v16 = vld [vmem:[%s6376_s3 + $0x38] sm:$0xff] }
 0x422   :  { %v2595_v40 = vmax.f32 %v2575_v39, 0.0 }
 0x423   :  { %v2596_v0 = vmax.f32 %v2576_v59, 0.0  ;;  %v2498_v26 = vpop.f32.mrb[48].mxu1 }
 0x424   :  { %v2577_v38 = vadd.f32 %v6007_v47, %v2498_v26  ;;  %v2500_v5 = vpop.f32.mrb[49].mxu1 }
 0x425   :  { %v6021_v41 = vmax.f32 %v2595_v40, %v2596_v0  ;;  %v2578_v7 = vadd.f32 %v6012_v60, %v2500_v5  ;;  %v3984_v40 = vpack.c.bf16 %v2635_v16, %v2634_v25  ;;  %v2637_v5 = vld [vmem:[%s6376_s3 + $0x48] sm:$0xff] }
 0x426   :  { %v2597_v42 = vmax.f32 %v2577_v38, 0.0  ;;  %v2636_v38 = vld [vmem:[%s6376_s3 + $0x40] sm:$0xff]  ;;  %v2813_v25 = vld [vmem:[%s6376_s3 + $0x168] sm:$0xff] }
 0x427   :  { %v2623_v48 = vmax.f32 %v6017_v53, %v6021_v41  ;;  %v2598_v1 = vmax.f32 %v2578_v7, 0.0  ;;  %v2504_v4 = vpop.f32.mrb[50].mxu1  ;;  %v2806_v53 = vld [vmem:[%s6376_s3 + $0x130] sm:$0xff]  ;;  %v2807_v41 = vld [vmem:[%s6376_s3 + $0x138] sm:$0xff] }
 0x428   :  { %v2579_v43 = vadd.f32 %v6007_v47, %v2504_v4  ;;  %v2506_v10 = vpop.f32.mrb[51].mxu1 }
 0x429   :  { %v2615_v2 = vmax.f32 %v2597_v42, %v2598_v1  ;;  %v2580_v11 = vadd.f32 %v6012_v60, %v2506_v10  ;;  %v3987_v10 = vpack.c.bf16 %v2637_v5, %v2636_v38  ;;  %v2890_v38 = vld [vmem:[%s6376_s3 + $0x198] sm:$0xff] }
 0x42a   :  { %v2599_v28 = vmax.f32 %v2579_v43, 0.0 }
 0x42b   :  { %v2600_v55 = vmax.f32 %v2580_v11, 0.0  ;;  %v2510_v46 = vpop.f32.mrb[52].mxu1 }
 0x42c   :  { %v2581_v29 = vadd.f32 %v6007_v47, %v2510_v46  ;;  %v2512_v56 = vpop.f32.mrb[53].mxu1  ;;  %v2639_v46 = vld [vmem:[%s6376_s3 + $0x58] sm:$0xff] }
 0x42d   :  { %v2616_v24 = vmax.f32 %v2599_v28, %v2600_v55  ;;  %v2582_v31 = vadd.f32 %v6012_v60, %v2512_v56  ;;  %v2638_v55 = vld [vmem:[%s6376_s3 + $0x50] sm:$0xff] }
 0x42e   :  { %v2601_v45 = vmax.f32 %v2581_v29, 0.0 }
 0x42f   :  { %v2624_v33 = vmax.f32 %v2615_v2, %v2616_v24  ;;  %v2602_v18 = vmax.f32 %v2582_v31, 0.0  ;;  %v2516_v61 = vpop.f32.mrb[54].mxu1  ;;  %v3990_v31 = vpack.c.bf16 %v2639_v46, %v2638_v55  ;;  %v2898_v55 = vld [vmem:[%s6376_s3 + $0x1d8] sm:$0xff] }
 0x430   :  { %v2583_v50 = vadd.f32 %v6007_v47, %v2516_v61  ;;  %v2518_v20 = vpop.f32.mrb[55].mxu1  ;;  %v2642_v61 = vld [vmem:[%s6376_s3 + $0x70] sm:$0xff] }
 0x431   :  { %v6043_v62 = vmax.f32 %v2601_v45, %v2602_v18  ;;  %v2584_v17 = vadd.f32 %v6012_v60, %v2518_v20  ;;  %3550 = vmatmul.mubr.f32.vlgmr.msra.gmra.mrb[64].mxu1 %v2624_v33  ;;  %v2641_v33 = vld [vmem:[%s6376_s3 + $0x68] sm:$0xff]  ;;  %v3996_v30 = vpack.c.bf16 %v2643_v14, %v2642_v61  ;;  %v2976_v61 = vld [vmem:[%s6376_s3 + $0x210] sm:$0xff]  ;;  %v2977_v14 = vld [vmem:[%s6376_s3 + $0x218] sm:$0xff] }
 0x432   :  { %v2603_v9 = vmax.f32 %v2583_v50, 0.0  ;;  %3976 = vmatpush3.bf16.msra.mxu1 %v3975_v12  ;;  %3584 = vmatprep.mubr.msk.f32.mxu1 %vm4481_vm1, %v6392_v63  ;;  %v2640_v12 = vld [vmem:[%s6376_s3 + $0x60] sm:$0xff]  ;;  %v2801_v20 = vld [vmem:[%s6376_s3 + $0x108] sm:$0xff] }
 0x433   :  { %v2604_v13 = vmax.f32 %v2584_v17, 0.0  ;;  %v2522_v3 = vpop.f32.mrb[56].mxu1  ;;  %3977 = vmatprep.subr.bf16.mxu1 %v4480_v44  ;;  %v3993_v18 = vpack.c.bf16 %v2641_v33, %v2640_v12  ;;  %v2800_v50 = vld [vmem:[%s6376_s3 + $0x100] sm:$0xff]  ;;  %v2975_v33 = vld [vmem:[%s6376_s3 + $0x208] sm:$0xff] }
 0x434   :  { %v2585_v8 = vadd.f32 %v6007_v47, %v2522_v3  ;;  %v2524_v27 = vpop.f32.mrb[57].mxu1  ;;  %v3999_v17 = vpack.c.bf16 %v2801_v20, %v2800_v50  ;;  %v2804_v3 = vld [vmem:[%s6376_s3 + $0x120] sm:$0xff]  ;;  %v2979_v20 = vld [vmem:[%s6376_s3 + $0x228] sm:$0xff] }
 0x435   :  { %v6056_v21 = vmax.f32 %v2603_v9, %v2604_v13  ;;  %v2586_v51 = vadd.f32 %v6012_v60, %v2524_v27  ;;  %v2802_v9 = vld [vmem:[%s6376_s3 + $0x110] sm:$0xff]  ;;  %v4005_v19 = vpack.c.bf16 %v2805_v6, %v2804_v3  ;;  %v2809_v27 = vld [vmem:[%s6376_s3 + $0x148] sm:$0xff]  ;;  %v2974_v12 = vld [vmem:[%s6376_s3 + $0x200] sm:$0xff] }
 0x436   :  { %v2605_v32 = vmax.f32 %v2585_v8, 0.0  ;;  %3979 = vmatpush3.bf16.msra.mxu1 %v3978_v23  ;;  %v2803_v23 = vld [vmem:[%s6376_s3 + $0x118] sm:$0xff]  ;;  %v2808_v8 = vld [vmem:[%s6376_s3 + $0x140] sm:$0xff]  ;;  %v2984_v3 = vld [vmem:[%s6376_s3 + $0x250] sm:$0xff] }
 0x437   :  { %v2625_v22 = vmax.f32 %v6043_v62, %v6056_v21  ;;  %v2606_v37 = vmax.f32 %v2586_v51, 0.0  ;;  %v2528_v57 = vpop.f32.mrb[58].mxu1  ;;  %3980 = vmatprep.subr.bf16.mxu1 %v4480_v44  ;;  %v4002_v13 = vpack.c.bf16 %v2803_v23, %v2802_v9  ;;  %v4011_v51 = vpack.c.bf16 %v2809_v27, %v2808_v8  ;;  %v2893_v62 = vld [vmem:[%s6376_s3 + $0x1b0] sm:$0xff]  ;;  %v2894_v21 = vld [vmem:[%s6376_s3 + $0x1b8] sm:$0xff]  ;;  %v2978_v50 = vld [vmem:[%s6376_s3 + $0x220] sm:$0xff] }
 0x438   :  { %v2587_v15 = vadd.f32 %v6007_v47, %v2528_v57  ;;  %v2530_v52 = vpop.f32.mrb[59].mxu1  ;;  %v2812_v57 = vld [vmem:[%s6376_s3 + $0x160] sm:$0xff]  ;;  %v2983_v23 = vld [vmem:[%s6376_s3 + $0x248] sm:$0xff]  ;;  %v2985_v6 = vld [vmem:[%s6376_s3 + $0x258] sm:$0xff] }
 0x439   :  { %v6069_v39 = vmax.f32 %v2605_v32, %v2606_v37  ;;  %v2588_v58 = vadd.f32 %v6012_v60, %v2530_v52  ;;  %v2810_v32 = vld [vmem:[%s6376_s3 + $0x150] sm:$0xff]  ;;  %v4017_v16 = vpack.c.bf16 %v2813_v25, %v2812_v57  ;;  %v2815_v52 = vld [vmem:[%s6376_s3 + $0x178] sm:$0xff]  ;;  %v2982_v9 = vld [vmem:[%s6376_s3 + $0x240] sm:$0xff] }
 0x43a   :  { %v2607_v59 = vmax.f32 %v2587_v15, 0.0  ;;  %3982 = vmatpush3.bf16.msra.mxu1 %v3981_v36  ;;  %v2811_v36 = vld [vmem:[%s6376_s3 + $0x158] sm:$0xff]  ;;  %v2814_v15 = vld [vmem:[%s6376_s3 + $0x170] sm:$0xff]  ;;  %v3072_v25 = vld [vmem:[%s6377_s4 + $0x28] sm:$0xff] }
 0x43b   :  { %v2608_v0 = vmax.f32 %v2588_v58, 0.0  ;;  %v2534_v26 = vpop.f32.mrb[60].mxu1  ;;  %3983 = vmatprep.subr.bf16.mxu1 %v4480_v44  ;;  %v4014_v37 = vpack.c.bf16 %v2811_v36, %v2810_v32  ;;  %v4020_v58 = vpack.c.bf16 %v2815_v52, %v2814_v15  ;;  %v2988_v8 = vld [vmem:[%s6376_s3 + $0x270] sm:$0xff]  ;;  %v2989_v27 = vld [vmem:[%s6376_s3 + $0x278] sm:$0xff]  ;;  %v3067_v32 = vld [vmem:[%s6377_s4] sm:$0xff] }
 0x43c   :  { %v2589_v7 = vadd.f32 %v6007_v47, %v2534_v26  ;;  %v2536_v42 = vpop.f32.mrb[61].mxu1  ;;  %v2889_v26 = vld [vmem:[%s6376_s3 + $0x190] sm:$0xff]  ;;  %v3068_v36 = vld [vmem:[%s6377_s4 + $0x8] sm:$0xff]  ;;  %v3074_v52 = vld [vmem:[%s6377_s4 + $0x38] sm:$0xff] }
 0x43d   :  { %v6080_v1 = vmax.f32 %v2607_v59, %v2608_v0  ;;  %v2590_v4 = vadd.f32 %v6012_v60, %v2536_v42  ;;  %v2887_v59 = vld [vmem:[%s6376_s3 + $0x180] sm:$0xff]  ;;  %v4026_v5 = vpack.c.bf16 %v2890_v38, %v2889_v26  ;;  %v2892_v42 = vld [vmem:[%s6376_s3 + $0x1a8] sm:$0xff]  ;;  %v4071_v57 = vpack.c.bf16 %v3068_v36, %v3067_v32  ;;  %v3073_v15 = vld [vmem:[%s6377_s4 + $0x30] sm:$0xff] }
 0x43e   :  { %v2609_v43 = vmax.f32 %v2589_v7, 0.0  ;;  %3985 = vmatpush3.bf16.msra.mxu1 %v3984_v40  ;;  %v2888_v40 = vld [vmem:[%s6376_s3 + $0x188] sm:$0xff]  ;;  %v2891_v7 = vld [vmem:[%s6376_s3 + $0x1a0] sm:$0xff]  ;;  %v3077_v26 = vld [vmem:[%s6377_s4 + $0x50] sm:$0xff] }
 0x43f   :  { %v2626_v2 = vmax.f32 %v6069_v39, %v6080_v1  ;;  %v2610_v11 = vmax.f32 %v2590_v4, 0.0  ;;  %v2540_v28 = vpop.f32.mrb[62].mxu1  ;;  %3986 = vmatprep.subr.bf16.mxu1 %v4480_v44  ;;  %v4023_v0 = vpack.c.bf16 %v2888_v40, %v2887_v59  ;;  %v4029_v4 = vpack.c.bf16 %v2892_v42, %v2891_v7  ;;  %v2980_v39 = vld [vmem:[%s6376_s3 + $0x230] sm:$0xff]  ;;  %v2981_v1 = vld [vmem:[%s6376_s3 + $0x238] sm:$0xff]  ;;  %v3075_v59 = vld [vmem:[%s6377_s4 + $0x40] sm:$0xff] }
 0x440   :  { %v2591_v49 = vadd.f32 %v6007_v47, %v2540_v28  ;;  %v2542_v54 = vpop.f32.mrb[63].mxu1  ;;  %v2897_v28 = vld [vmem:[%s6376_s3 + $0x1d0] sm:$0xff]  ;;  %v3076_v40 = vld [vmem:[%s6377_s4 + $0x48] sm:$0xff]  ;;  %v3078_v38 = vld [vmem:[%s6377_s4 + $0x58] sm:$0xff] }
 0x441   :  { %v6093_v29 = vmax.f32 %v2609_v43, %v2610_v11  ;;  %v2592_v56 = vadd.f32 %v6012_v60, %v2542_v54  ;;  %v2895_v43 = vld [vmem:[%s6376_s3 + $0x1c0] sm:$0xff]  ;;  %v4038_v46 = vpack.c.bf16 %v2898_v55, %v2897_v28  ;;  %v2900_v54 = vld [vmem:[%s6376_s3 + $0x1e8] sm:$0xff] }
 0x442   :  { %v2611_v24 = vmax.f32 %v2591_v49, 0.0  ;;  %3988 = vmatpush3.bf16.msra.mxu1 %v3987_v10  ;;  %v2896_v10 = vld [vmem:[%s6376_s3 + $0x1c8] sm:$0xff]  ;;  %v2899_v49 = vld [vmem:[%s6376_s3 + $0x1e0] sm:$0xff] }
 0x443   :  { %v2612_v45 = vmax.f32 %v2592_v56, 0.0  ;;  %3989 = vmatprep.subr.bf16.mxu1 %v4480_v44  ;;  %v4035_v11 = vpack.c.bf16 %v2896_v10, %v2895_v43  ;;  %v4041_v56 = vpack.c.bf16 %v2900_v54, %v2899_v49  ;;  %v3079_v7 = vld [vmem:[%s6377_s4 + $0x60] sm:$0xff]  ;;  %v3080_v42 = vld [vmem:[%s6377_s4 + $0x68] sm:$0xff] }
 0x445   :  { %v6103_v47 = vmax.f32 %v2611_v24, %v2612_v45  ;;  %v2901_v24 = vld [vmem:[%s6376_s3 + $0x1f0] sm:$0xff] }
 0x446   :  { %3991 = vmatpush3.bf16.msra.mxu1 %v3990_v31  ;;  %v2902_v31 = vld [vmem:[%s6376_s3 + $0x1f8] sm:$0xff] }
 0x447   :  { %v2627_v60 = vmax.f32 %v6093_v29, %v6103_v47  ;;  %3992 = vmatprep.subr.bf16.mxu1 %v4480_v44  ;;  %v4044_v45 = vpack.c.bf16 %v2902_v31, %v2901_v24  ;;  %v3070_v29 = vld [vmem:[%s6377_s4 + $0x18] sm:$0xff]  ;;  %v3063_v24 = vsub.s32 2, %v6399_v34 }
 0x449   :  { %v3064_v31 = vrot.slane %v6004_v35, %v3063_v24 }
 0x44a   :  { %3994 = vmatpush3.bf16.msra.mxu1 %v3993_v18  ;;  %v4047_v18 = vpack.c.bf16 %v2975_v33, %v2974_v12 }
 0x44b   :  { %3995 = vmatprep.subr.bf16.mxu1 %v4480_v44 }
 0x44e   :  { %3997 = vmatpush3.bf16.msra.mxu1 %v3996_v30  ;;  %v4050_v30 = vpack.c.bf16 %v2977_v14, %v2976_v61  ;;  %v3162_v61 = vld [vmem:[#allocation4 + $0x8] sm:$0xff] }
 0x44f   :  { %3998 = vmatprep.subr.bf16.mxu1 %v4480_v44 }
 0x451   :  { %3585 = vmatmul.mubr.f32.vlgmr.msra.gmra.mrb[66].mxu1 %v2623_v48  ;;  %v4008_v48 = vpack.c.bf16 %v2807_v41, %v2806_v53  ;;  %v2986_v53 = vld [vmem:[%s6376_s3 + $0x260] sm:$0xff]  ;;  %v2987_v41 = vld [vmem:[%s6376_s3 + $0x268] sm:$0xff] }
 0x452   :  { %4000 = vmatpush3.bf16.msra.mxu1 %v3999_v17  ;;  %3619 = vmatprep.mubr.msk.f32.mxu1 %vm4481_vm1, %v6392_v63  ;;  %v4053_v17 = vpack.c.bf16 %v2979_v20, %v2978_v50  ;;  %v3163_v20 = vld [vmem:[#allocation4 + $0x10] sm:$0xff] }
 0x453   :  { %4001 = vmatprep.subr.bf16.mxu1 %v4480_v44 }
 0x456   :  { %4003 = vmatpush3.bf16.msra.mxu1 %v4002_v13  ;;  %v4059_v13 = vpack.c.bf16 %v2983_v23, %v2982_v9  ;;  %v3167_v23 = vld [vmem:[#allocation4 + $0x30] sm:$0xff] }
 0x457   :  { %4004 = vmatprep.subr.bf16.mxu1 %v4480_v44 }
 0x45a   :  { %4006 = vmatpush3.bf16.msra.mxu1 %v4005_v19  ;;  %v4062_v19 = vpack.c.bf16 %v2985_v6, %v2984_v3  ;;  %v3169_v6 = vld [vmem:[#allocation4 + $0x40] sm:$0xff] }
 0x45b   :  { %4007 = vmatprep.subr.bf16.mxu1 %v4480_v44 }
 0x45e   :  { %4009 = vmatpush3.bf16.msra.mxu1 %v4008_v48  ;;  %v4065_v48 = vpack.c.bf16 %v2987_v41, %v2986_v53  ;;  %v3171_v41 = vld [vmem:[#allocation4 + $0x50] sm:$0xf] }
 0x45f   :  { %4010 = vmatprep.subr.bf16.mxu1 %v4480_v44 }
 0x462   :  { %4012 = vmatpush3.bf16.msra.mxu1 %v4011_v51  ;;  %v4068_v51 = vpack.c.bf16 %v2989_v27, %v2988_v8 }
 0x463   :  { %4013 = vmatprep.subr.bf16.mxu1 %v4480_v44 }
 0x466   :  { %4015 = vmatpush3.bf16.msra.mxu1 %v4014_v37  ;;  %v3069_v37 = vld [vmem:[%s6377_s4 + $0x10] sm:$0xff] }
 0x467   :  { %4016 = vmatprep.subr.bf16.mxu1 %v4480_v44  ;;  %v4074_v47 = vpack.c.bf16 %v3070_v29, %v3069_v37 }
 0x46a   :  { %4018 = vmatpush3.bf16.msra.mxu1 %v4017_v16 }
 0x46b   :  { %4019 = vmatprep.subr.bf16.mxu1 %v4480_v44 }
 0x46e   :  { %4021 = vmatpush3.bf16.msra.mxu1 %v4020_v58  ;;  %v4080_v58 = vpack.c.bf16 %v3074_v52, %v3073_v15 }
 0x46f   :  { %4022 = vmatprep.subr.bf16.mxu1 %v4480_v44 }
 0x471   :  { %3620 = vmatmul.mubr.f32.vlgmr.msra.gmra.mrb[68].mxu1 %v2625_v22  ;;  %v4032_v22 = vpack.c.bf16 %v2894_v21, %v2893_v62  ;;  %v4089_v62 = vpack.c.bf16 %v3080_v42, %v3079_v7 }
 0x472   :  { %4024 = vmatpush3.bf16.msra.mxu1 %v4023_v0  ;;  %3654 = vmatprep.mubr.msk.f32.mxu1 %vm4481_vm1, %v6392_v63  ;;  %v4083_v0 = vpack.c.bf16 %v3076_v40, %v3075_v59 }
 0x473   :  { %4025 = vmatprep.subr.bf16.mxu1 %v4480_v44 }
 0x476   :  { %4027 = vmatpush3.bf16.msra.mxu1 %v4026_v5  ;;  %v4086_v5 = vpack.c.bf16 %v3078_v38, %v3077_v26 }
 0x477   :  { %4028 = vmatprep.subr.bf16.mxu1 %v4480_v44 }
 0x47a   :  { %4030 = vmatpush3.bf16.msra.mxu1 %v4029_v4 }
 0x47b   :  { %4031 = vmatprep.subr.bf16.mxu1 %v4480_v44 }
 0x47e   :  { %4033 = vmatpush3.bf16.msra.mxu1 %v4032_v22  ;;  %v3081_v22 = vld [vmem:[%s6377_s4 + $0x70] sm:$0xff] }
 0x47f   :  { %4034 = vmatprep.subr.bf16.mxu1 %v4480_v44 }
 0x482   :  { %4036 = vmatpush3.bf16.msra.mxu1 %v4035_v11 }
 0x483   :  { %4037 = vmatprep.subr.bf16.mxu1 %v4480_v44 }
 0x486   :  { %4039 = vmatpush3.bf16.msra.mxu1 %v4038_v46 }
 0x487   :  { %4040 = vmatprep.subr.bf16.mxu1 %v4480_v44 }
 0x48a   :  { %4042 = vmatpush3.bf16.msra.mxu1 %v4041_v56 }
 0x48b   :  { %4043 = vmatprep.subr.bf16.mxu1 %v4480_v44 }
 0x48e   :  { %4045 = vmatpush3.bf16.msra.mxu1 %v4044_v45 }
 0x48f   :  { %4046 = vmatprep.subr.bf16.mxu1 %v4480_v44 }
 0x491   :  { %3655 = vmatmul.mubr.f32.vlgmr.msra.gmra.mrb[70].mxu1 %v2626_v2  ;;  %v4056_v2 = vpack.c.bf16 %v2981_v1, %v2980_v39  ;;  %v3165_v1 = vld [vmem:[#allocation4 + $0x20] sm:$0xff] }
 0x492   :  { %4048 = vmatpush3.bf16.msra.mxu1 %v4047_v18  ;;  %3689 = vmatprep.mubr.msk.f32.mxu1 %vm4481_vm1, %v6392_v63  ;;  %v3161_v18 = vld [vmem:[#allocation4] sm:$0xff] }
 0x493   :  { %4049 = vmatprep.subr.bf16.mxu1 %v4480_v44 }
 0x496   :  { %4051 = vmatpush3.bf16.msra.mxu1 %v4050_v30  ;;  %v4092_v30 = vpack.c.bf16 %v3162_v61, %v3161_v18 }
 0x497   :  { %4052 = vmatprep.subr.bf16.mxu1 %v4480_v44 }
 0x49a   :  { %4054 = vmatpush3.bf16.msra.mxu1 %v4053_v17  ;;  %v3164_v17 = vld [vmem:[#allocation4 + $0x18] sm:$0xff] }
 0x49b   :  { %4055 = vmatprep.subr.bf16.mxu1 %v4480_v44  ;;  %v4095_v39 = vpack.c.bf16 %v3164_v17, %v3163_v20 }
 0x49e   :  { %4057 = vmatpush3.bf16.msra.mxu1 %v4056_v2  ;;  %v3166_v2 = vld [vmem:[#allocation4 + $0x28] sm:$0xff] }
 0x49f   :  { %4058 = vmatprep.subr.bf16.mxu1 %v4480_v44  ;;  %v4098_v9 = vpack.c.bf16 %v3166_v2, %v3165_v1 }
 0x4a2   :  { %4060 = vmatpush3.bf16.msra.mxu1 %v4059_v13  ;;  %v3168_v13 = vld [vmem:[#allocation4 + $0x38] sm:$0xff] }
 0x4a3   :  { %4061 = vmatprep.subr.bf16.mxu1 %v4480_v44  ;;  %v4101_v3 = vpack.c.bf16 %v3168_v13, %v3167_v23 }
 0x4a6   :  { %4063 = vmatpush3.bf16.msra.mxu1 %v4062_v19  ;;  %v3170_v19 = vld [vmem:[#allocation4 + $0x48] sm:$0xff] }
 0x4a7   :  { %4064 = vmatprep.subr.bf16.mxu1 %v4480_v44  ;;  %v4104_v53 = vpack.c.bf16 %v3170_v19, %v3169_v6 }
 0x4aa   :  { %4066 = vmatpush3.bf16.msra.mxu1 %v4065_v48  ;;  %v3084_v48 = vsub.s32 3, %v6399_v34 }
 0x4ab   :  { %4067 = vmatprep.subr.bf16.mxu1 %v4480_v44 }
 0x4ac   :  { %v3085_v8 = vrot.slane %v6004_v35, %v3084_v48 }
 0x4ae   :  { %4069 = vmatpush3.bf16.msra.mxu1 %v4068_v51 }
 0x4af   :  { %4070 = vmatprep.subr.bf16.mxu1 %v4480_v44 }
 0x4b1   :  { %3690 = vmatmul.mubr.f32.vlgmr.msra.gmra.mrb[72].mxu1 %v2627_v60  ;;  %v3071_v60 = vld [vmem:[%s6377_s4 + $0x20] sm:$0xff] }
 0x4b2   :  { %3722 = vmatprep.mubr.msk.f32.mxu1 %vm4481_vm1, %v6392_v63  ;;  %4072 = vmatpush3.bf16.msra.mxu1 %v4071_v57  ;;  %v4077_v16 = vpack.c.bf16 %v3072_v25, %v3071_v60 }
 0x4b3   :  { %4073 = vmatprep.subr.bf16.mxu1 %v4480_v44 }
 0x4b6   :  { %4075 = vmatpush3.bf16.msra.mxu1 %v4074_v47 }
 0x4b7   :  { %4076 = vmatprep.subr.bf16.mxu1 %v4480_v44 }
 0x4ba   :  { %4078 = vmatpush3.bf16.msra.mxu1 %v4077_v16 }
 0x4bb   :  { %4079 = vmatprep.subr.bf16.mxu1 %v4480_v44 }
 0x4be   :  { %4081 = vmatpush3.bf16.msra.mxu1 %v4080_v58 }
 0x4bf   :  { %4082 = vmatprep.subr.bf16.mxu1 %v4480_v44 }
 0x4c2   :  { %4084 = vmatpush3.bf16.msra.mxu1 %v4083_v0 }
 0x4c3   :  { %4085 = vmatprep.subr.bf16.mxu1 %v4480_v44 }
 0x4c6   :  { %4087 = vmatpush3.bf16.msra.mxu1 %v4086_v5 }
 0x4c7   :  { %4088 = vmatprep.subr.bf16.mxu1 %v4480_v44 }
 0x4ca   :  { %4090 = vmatpush3.bf16.msra.mxu1 %v4089_v62 }
 0x4cb   :  { %3720 = vmatprep.subr.mxu1 %v6392_v63 }
 0x4ce   :  { %3721 = vmatpush3.msra.mxu1 %v3081_v22 }
 0x4cf   :  { %4091 = vmatprep.subr.bf16.mxu1 %v4480_v44 }
 0x504   :  { %v2726_v4 = vpop.f32.mrb[64].mxu1 }
 0x505   :  { %v3551_v21 = vpop.f32.mrb[65].mxu1 }
 0x524   :  { %v2796_v43 = vpop.f32.mrb[66].mxu1 }
 0x525   :  { %v2797_v10 = vadd.f32 %v2796_v43, %v2726_v4  ;;  %v3586_v11 = vpop.f32.mrb[67].mxu1 }
 0x544   :  { %v2882_v28 = vpop.f32.mrb[68].mxu1 }
 0x545   :  { %v2886_v55 = vadd.f32 %v2882_v28, %v2797_v10  ;;  %v3621_v46 = vpop.f32.mrb[69].mxu1 }
 0x564   :  { %v2969_v49 = vpop.f32.mrb[70].mxu1 }
 0x565   :  { %v2973_v54 = vadd.f32 %v2969_v49, %v2886_v55  ;;  %v3656_v56 = vpop.f32.mrb[71].mxu1 }
 0x584   :  { %v3056_v45 = vpop.f32.mrb[72].mxu1 }
 0x585   :  { %v3060_v12 = vadd.f32 %v3056_v45, %v2973_v54  ;;  %v3691_v33 = vpop.f32.mrb[73].mxu1 }
 0x587   :  { %v3065_v14 = vadd.f32 %v3064_v31, %v3060_v12 }
 0x589   :  { %v3066_v50 = vmax.f32 %v3065_v14, 0.0 }
 0x58b   :  { %3723 = vmatmul.mubr.msk.f32.vlgmr.msra.gmra.mrb[74].mxu1 %vm3086_vm2, %v3066_v50 }
 0x58c   :  { %4093 = vmatpush3.bf16.msra.mxu1 %v4092_v30  ;;  %3747 = vmatprep.mubr.msk.f32.mxu1 %vm4481_vm1, %v6392_v63 }
 0x58d   :  { %4094 = vmatprep.subr.bf16.mxu1 %v4480_v44 }
 0x590   :  { %4096 = vmatpush3.bf16.msra.mxu1 %v4095_v39 }
 0x591   :  { %4097 = vmatprep.subr.bf16.mxu1 %v4480_v44 }
 0x594   :  { %4099 = vmatpush3.bf16.msra.mxu1 %v4098_v9 }
 0x595   :  { %4100 = vmatprep.subr.bf16.mxu1 %v4480_v44 }
 0x598   :  { %4102 = vmatpush3.bf16.msra.mxu1 %v4101_v3 }
 0x599   :  { %4103 = vmatprep.subr.bf16.mxu1 %v4480_v44  ;;  %v3174_v44 = vsub.s32 4, %v6399_v34 }
 0x59b   :  { %v3175_v37 = vrot.slane %v6004_v35, %v3174_v44 }
 0x59c   :  { %4105 = vmatpush3.bf16.msra.mxu1 %v4104_v53 }
 0x59d   :  { %3745 = vmatprep.subr.mxu1 %v6392_v63 }
 0x5a0   :  { %3746 = vmatpush3.msk.msra.mxu1 %vm3180_vm3, %v3171_v41 }
 0x65e   :  { %v3156_v27 = vpop.f32.mrb[74].mxu1 }
 0x65f   :  { %v3157_v51 = vadd.f32 %v3156_v27, %v3085_v8  ;;  %v3724_v32 = vpop.f32.mrb[75].mxu1 }
 0x661   :  { %v3160_v36 = vmax.f32 %v3157_v51, 0.0 }
 0x663   :  { %3748 = vmatmul.mubr.msk.f32.vlgmr.msra.gmra.mrb[76].mxu1 %vm3176_vm4, %v3160_v36 }
 0x736   :  { %v3250_v57 = vpop.f32.mrb[76].mxu1 }
 0x737   :  { %v3251_v29 = vadd.f32 %v3250_v57, %v3175_v37  ;;  %v3749_v63 = vpop.f32.mrb[77].mxu1 }
 0x739   :  { %3254 = vst [vmem:[%s6380_s7] sm:$0xff] %v3251_v29 }
 0x73a   :  { %3259 = vsyncpa [#allocation3], 1 }
 0x73b   :  { %3260 = vsyncpa [#allocation5], 1 }

</bundles_post_ra>
